<compile_context>
chip_gen: v7x
topology: tpu7x:2x2x1
jax: 0.10.0
libtpu: 0.0.40
codegen_flags: <defaults>
</compile_context>

<pallas_src>
import math
from functools import partial

import numpy as np
import jax
import jax.numpy as jnp
from jax import lax
from jax.experimental import pallas as pl
from jax.experimental.pallas import tpu as pltpu


def _round_up(n, m):
    return (n + m - 1) // m * m


# ----------------------------- Pallas kernel --------------------------------
def residual_block_kernel(
    y_hbm,      # (B, L + 2*dilation, Cp) f32, HBM (pl.ANY): zero-padded (x + d)
    cond_ref,   # (tl, Ep)                conditioner tile (compute dtype)
    d_ref,      # (1, Cp)                 diffusion projection, f32
    wgf_ref,    # (Kf, 2Cp)               fused [tap0;tap1;tap2;cond] -> [gate|filter]
    bgf_ref,    # (1, 2Cp)                gate|filter bias (dil_b + cond_b), f32
    wrs_ref,    # (Cp, 2Cp)               output projection -> [residual|skip]
    brs_ref,    # (1, 2Cp)
    res_ref,    # (tl, Cp)                output: (x + residual) / sqrt(2)
    skip_ref,   # (tl, Cp)                output: skip
    ybuf,       # (2, tl + 2*dilation, Cp) f32 VMEM halo double buffer
    sem,        # DMA semaphores (2,)
    *, tl: int, dilation: int, compute_dtype, fuse_k: bool,
):
    b = pl.program_id(0)
    l = pl.program_id(1)
    nl = pl.num_programs(1)
    wlen = tl + 2 * dilation
    Cp = res_ref.shape[-1]
    Ep = cond_ref.shape[-1]
    f32 = jnp.float32

    def halo_copy(l_idx, slot):
        return pltpu.make_async_copy(
            y_hbm.at[b, pl.ds(l_idx * tl, wlen), :],
            ybuf.at[slot],
            sem.at[slot],
        )

    # Prime the per-batch chain (l axis is "arbitrary": runs in order per core).
    @pl.when(l == 0)
    def _():
        halo_copy(0, 0).start()

    # Prefetch the next window while computing this one (double-buffered).
    @pl.when(l + 1 < nl)
    def _():
        halo_copy(l + 1, (l + 1) % 2).start()

    slot = l % 2
    halo_copy(l, slot).wait()

    # Direct ref reads of the three dilated-conv taps (no window temporary).
    left = ybuf[slot, pl.ds(0, tl), :]                    # tap k = 0, f32
    mid = ybuf[slot, pl.ds(dilation, tl), :]              # tap k = 1 (== x + d)
    right = ybuf[slot, pl.ds(2 * dilation, tl), :]        # tap k = 2
    cond = cond_ref[...]                                  # (tl, Ep), compute dtype

    if fuse_k:
        # Fused-K operand: one long-K matmul per stage (best on v6e/v7x MXU).
        a = jnp.concatenate(
            [left.astype(compute_dtype),
             mid.astype(compute_dtype),
             right.astype(compute_dtype),
             cond],
            axis=-1)                                      # (tl, 3Cp + Ep)
        gatefilt = jnp.dot(a, wgf_ref[...], preferred_element_type=f32)
    else:
        # v5e-friendly: four accumulating K=Cp dots, no operand concat copy.
        gatefilt = (
            jnp.dot(left.astype(compute_dtype), wgf_ref[0:Cp, :],
                    preferred_element_type=f32)
            + jnp.dot(mid.astype(compute_dtype), wgf_ref[Cp:2 * Cp, :],
                      preferred_element_type=f32)
            + jnp.dot(right.astype(compute_dtype), wgf_ref[2 * Cp:3 * Cp, :],
                      preferred_element_type=f32)
            + jnp.dot(cond, wgf_ref[3 * Cp:3 * Cp + Ep, :],
                      preferred_element_type=f32))
    gatefilt = gatefilt + bgf_ref[...]                    # (tl, 2Cp) f32

    # Static 128-aligned lane splits (whole-vreg, free).
    gate = gatefilt[:, 0:Cp]
    filt = gatefilt[:, Cp:2 * Cp]

    # Element-wise path kept in f32 (v5e has no bf16 VPU/EUP).
    h = jax.nn.sigmoid(gate) * jnp.tanh(filt)             # (tl, Cp) f32

    rs = jnp.dot(h.astype(compute_dtype), wrs_ref[...],
                 preferred_element_type=f32) + brs_ref[...]   # (tl, 2Cp) f32
    res_out = rs[:, 0:Cp]
    skip_out = rs[:, Cp:2 * Cp]

    # Recover raw x without a second HBM read of x:  x = (x + d) - d.
    x = mid - d_ref[...]
    inv_sqrt2 = 1.0 / math.sqrt(2.0)
    res_ref[...] = ((x + res_out) * inv_sqrt2).astype(res_ref.dtype)
    skip_ref[...] = skip_out.astype(skip_ref.dtype)


# ------------------------------ JAX wrapper ----------------------------------
def residual_block(x_ncl, cond_nel, diffusion_step, params, *, dilation,
                   compute_dtype=jnp.bfloat16, tl=None, fuse_k=True):
    """PyTorch-style interface: x [B,C,L], conditioner [B,E,L], diff_step [B,C]."""
    B, C, L = x_ncl.shape
    E = cond_nel.shape[1]
    f32 = jnp.float32

    Cp = _round_up(C, 128)
    Ep = _round_up(E, 128)
    Kf = 3 * Cp + Ep

    if tl is None:
        # Halo-tiled y keeps VMEM independent of L, so larger tiles are cheap.
        tl = L if L <= 512 else 512
    assert L % tl == 0 and tl % 16 == 0, "tile must divide L and be sublane-aligned"
    nl = L // tl
    wlen = tl + 2 * dilation

    # ---- diffusion projection in plain XLA (tiny GEMM; removes 2 kernel inputs)
    d = (diffusion_step.astype(f32) @ params["diff_w"].T.astype(f32)
         + params["diff_b"].astype(f32))                         # [B, C]
    d = jnp.pad(d, ((0, 0), (0, Cp - C)))[:, None, :]            # [B, 1, Cp]

    # ---- activations: NCL -> NLC, channel-pad to 128, add d, zero-pad L halo.
    x_nlc = jnp.pad(jnp.transpose(x_ncl, (0, 2, 1)).astype(f32),
                    ((0, 0), (0, 0), (0, Cp - C)))               # [B, L, Cp]
    y_pad = jnp.pad(x_nlc + d, ((0, 0), (dilation, dilation), (0, 0)))  # [B, L+2d, Cp]

    cond = jnp.pad(jnp.transpose(cond_nel, (0, 2, 1)),
                   ((0, 0), (0, 0), (0, Ep - E))).astype(compute_dtype)  # [B, L, Ep]

    # ---- weight prep: fuse taps+conditioner on K, gate|filter / res|skip on N.
    def pad2(w, r, c):
        return jnp.pad(w, ((0, r - w.shape[0]), (0, c - w.shape[1])))

    taps = [params["dil_w"][:, :, k].T for k in range(3)]   # each (C, 2C)
    wc = params["cond_w"][:, :, 0].T                         # (E, 2C)
    wo = params["out_w"][:, :, 0].T                          # (C, 2C)

    def k_half(lo, hi):  # one output half, padded to Cp columns
        blocks = [pad2(t[:, lo:hi], Cp, Cp) for t in taps] + [pad2(wc[:, lo:hi], Ep, Cp)]
        return jnp.concatenate(blocks, axis=0)               # (Kf, Cp)

    Wgf = jnp.concatenate([k_half(0, C), k_half(C, 2 * C)],
                          axis=1).astype(compute_dtype)       # (Kf, 2Cp)
    bz = params["dil_b"] + params["cond_b"]
    bgf = jnp.concatenate([jnp.pad(bz[:C], (0, Cp - C)),
                           jnp.pad(bz[C:], (0, Cp - C))])[None, :].astype(f32)

    Wrs = jnp.concatenate([pad2(wo[:, :C], Cp, Cp), pad2(wo[:, C:], Cp, Cp)],
                          axis=1).astype(compute_dtype)       # (Cp, 2Cp)
    brs = jnp.concatenate([jnp.pad(params["out_b"][:C], (0, Cp - C)),
                           jnp.pad(params["out_b"][C:], (0, Cp - C))])[None, :].astype(f32)

    csize = np.dtype(compute_dtype).itemsize

    # ---- cost estimate (lets XLA schedule neighbors around the custom call)
    flops = 2 * B * L * (Kf * 2 * Cp + Cp * 2 * Cp)
    transcendentals = 2 * B * L * Cp
    bytes_accessed = int(y_pad.size * 4 + cond.size * csize + d.size * 4
                         + Wgf.size * csize + Wrs.size * csize
                         + (bgf.size + brs.size) * 4
                         + 2 * B * L * Cp * 4)
    cost = pl.CostEstimate(flops=flops, transcendentals=transcendentals,
                           bytes_accessed=bytes_accessed)

    # ---- explicit VMEM budget from the actual footprint, capped per chip.
    vmem_need = (
        2 * wlen * Cp * 4                                   # halo double buffer
        + 2 * tl * Ep * csize                               # cond (2 pipeline bufs)
        + 2 * 2 * tl * Cp * 4                               # both outputs (2 bufs)
        + 2 * ((Kf + Cp) * 2 * Cp * csize + 4 * Cp * 4 + Cp * 4)  # weights/biases/d
        + tl * (Kf * csize + 4 * 2 * Cp * 4)                # operand + f32 temps
    )
    try:
        phys_vmem = getattr(pltpu.get_tpu_info(), "vmem_capacity_bytes", None) or (64 << 20)
    except Exception:
        phys_vmem = 64 << 20
    vmem_limit = int(min(max(2 * vmem_need + (4 << 20), 32 << 20),
                         int(0.75 * phys_vmem)))

    full = lambda arr: pl.BlockSpec(arr.shape, lambda b, l: (0,) * arr.ndim)

    res, skip = pl.pallas_call(
        partial(residual_block_kernel, tl=tl, dilation=dilation,
                compute_dtype=compute_dtype, fuse_k=fuse_k),
        out_shape=(
            jax.ShapeDtypeStruct((B, L, Cp), f32),
            jax.ShapeDtypeStruct((B, L, Cp), f32),
        ),
        grid_spec=pltpu.PrefetchScalarGridSpec(
            num_scalar_prefetch=0,
            grid=(B, nl),
            in_specs=[
                # padded conv input stays in HBM; halo windows DMA'd manually
                pl.BlockSpec(memory_space=pl.ANY),
                # conditioner: tiled over L
                pl.BlockSpec((None, tl, Ep), lambda b, l: (b, l, 0)),
                # per-batch diffusion projection
                pl.BlockSpec((None, 1, Cp), lambda b, l: (b, 0, 0)),
                full(Wgf), full(bgf), full(Wrs), full(brs),
            ],
            out_specs=[
                pl.BlockSpec((None, tl, Cp), lambda b, l: (b, l, 0)),
                pl.BlockSpec((None, tl, Cp), lambda b, l: (b, l, 0)),
            ],
            scratch_shapes=[
                pltpu.VMEM((2, wlen, Cp), jnp.float32),
                pltpu.SemaphoreType.DMA((2,)),
            ],
        ),
        compiler_params=pltpu.CompilerParams(
            dimension_semantics=("parallel", "arbitrary"),
            vmem_limit_bytes=vmem_limit),
        cost_estimate=cost,
    )(y_pad, cond, d, Wgf, bgf, Wrs, brs)

    # back to NCL, drop channel padding
    res = jnp.transpose(res[:, :, :C], (0, 2, 1))
    skip = jnp.transpose(skip[:, :, :C], (0, 2, 1))
    return res, skip


# --------------------------- pure-JAX reference -------------------------------
def residual_block_ref(x, cond, diff, params, *, dilation):
    C = x.shape[1]
    dn = ("NCH", "OIH", "NCH")
    d = diff @ params["diff_w"].T + params["diff_b"]
    y = x + d[:, :, None]
    conv = lax.conv_general_dilated(
        y, params["dil_w"], (1,), [(dilation, dilation)],
        rhs_dilation=(dilation,), dimension_numbers=dn)
    conv = conv + params["dil_b"][None, :, None]
    cproj = lax.conv_general_dilated(
        cond, params["cond_w"], (1,), [(0, 0)], dimension_numbers=dn)
    cproj = cproj + params["cond_b"][None, :, None]
    z = conv + cproj
    gate, filt = z[:, :C], z[:, C:]
    y3 = jax.nn.sigmoid(gate) * jnp.tanh(filt)
    y4 = lax.conv_general_dilated(
        y3, params["out_w"], (1,), [(0, 0)], dimension_numbers=dn)
    y4 = y4 + params["out_b"][None, :, None]
    return (x + y4[:, :C]) / math.sqrt(2.0), y4[:, C:]


# ---------------------------------- main --------------------------------------
if __name__ == "__main__":
    B, C, E, L, dilation = 2, 8, 64, 64, 2
    TL = 32  # sequence tile (multiple of 16; 2 L-tiles per batch)

    key = jax.random.PRNGKey(0)
    ks = jax.random.split(key, 12)
    f32 = jnp.float32

    params = {
        "dil_w": 0.1 * jax.random.normal(ks[0], (2 * C, C, 3), f32),
        "dil_b": 0.1 * jax.random.normal(ks[1], (2 * C,), f32),
        "diff_w": 0.1 * jax.random.normal(ks[2], (C, C), f32),
        "diff_b": 0.1 * jax.random.normal(ks[3], (C,), f32),
        "cond_w": 0.1 * jax.random.normal(ks[4], (2 * C, E, 1), f32),
        "cond_b": 0.1 * jax.random.normal(ks[5], (2 * C,), f32),
        "out_w": 0.1 * jax.random.normal(ks[6], (2 * C, C, 1), f32),
        "out_b": 0.1 * jax.random.normal(ks[7], (2 * C,), f32),
    }

    x = jax.random.normal(ks[8], (B, C, L), f32)             # [B, residual_channels, seq]
    conditioner = jax.random.normal(ks[9], (B, E, L), f32)   # [B, encoder_hidden, seq]
    diffusion_step = jax.random.normal(ks[10], (B, C), f32)  # [B, residual_channels]

    res_ref, skip_ref = residual_block_ref(x, conditioner, diffusion_step,
                                           params, dilation=dilation)

    # f32 path, fused-K operand (v6e/v7x default): tight tolerance
    res, skip = residual_block(x, conditioner, diffusion_step, params,
                               dilation=dilation, compute_dtype=jnp.float32,
                               tl=TL, fuse_k=True)
    res, skip = jax.block_until_ready((res, skip))
    assert jnp.allclose(res, res_ref, atol=1e-4, rtol=1e-4)
    assert jnp.allclose(skip, skip_ref, atol=1e-4, rtol=1e-4)

    # f32 path, per-tap accumulating dots (v5e-friendly): tight tolerance
    res_t, skip_t = residual_block(x, conditioner, diffusion_step, params,
                                   dilation=dilation, compute_dtype=jnp.float32,
                                   tl=TL, fuse_k=False)
    res_t, skip_t = jax.block_until_ready((res_t, skip_t))
    assert jnp.allclose(res_t, res_ref, atol=1e-4, rtol=1e-4)
    assert jnp.allclose(skip_t, skip_ref, atol=1e-4, rtol=1e-4)

    # bf16 compute path (default; weights + conditioner bf16, f32 accumulation)
    res_b, skip_b = residual_block(x, conditioner, diffusion_step, params,
                                   dilation=dilation, tl=TL)
    res_b, skip_b = jax.block_until_ready((res_b, skip_b))
    assert jnp.allclose(res_b, res_ref, atol=5e-2, rtol=5e-2)
    assert jnp.allclose(skip_b, skip_ref, atol=5e-2, rtol=5e-2)

    print("KERNEL_OK")
</pallas_src>

<mosaic_0001>
module attributes {stable_mosaic.version = 11 : i64} {
  func.func @residual_block_kernel(%arg0: i32, %arg1: i32, %arg2: memref<2x68x128xf32, #tpu.memory_space<any>>, %arg3: memref<1x32x128xf32, #tpu.memory_space<vmem>>, %arg4: memref<1x1x128xf32, #tpu.memory_space<vmem>>, %arg5: memref<512x256xf32, #tpu.memory_space<vmem>>, %arg6: memref<1x256xf32, #tpu.memory_space<vmem>>, %arg7: memref<128x256xf32, #tpu.memory_space<vmem>>, %arg8: memref<1x256xf32, #tpu.memory_space<vmem>>, %arg9: memref<1x32x128xf32, #tpu.memory_space<vmem>>, %arg10: memref<1x32x128xf32, #tpu.memory_space<vmem>>, %arg11: memref<2x36x128xf32, #tpu.memory_space<vmem>>, %arg12: memref<2x!tpu.dma_semaphore, #tpu.memory_space<semaphore_mem>>) attributes {dimension_semantics = [#tpu.dimension_semantics<parallel>, #tpu.dimension_semantics<arbitrary>], iteration_bounds = array<i64: 2, 2>, scalar_prefetch = 0 : i64, scratch_operands = 2 : i64, tpu.core_type = #tpu.core_type<tc>, window_params = [{}, {transform_indices = @transform_1, window_bounds = array<i64: 1, 32, 128>}, {transform_indices = @transform_2, window_bounds = array<i64: 1, 1, 128>}, {pipeline_mode = #tpu.pipeline_mode<synchronous>, transform_indices = @transform_3, window_bounds = array<i64: 512, 256>}, {pipeline_mode = #tpu.pipeline_mode<synchronous>, transform_indices = @transform_4, window_bounds = array<i64: 1, 256>}, {pipeline_mode = #tpu.pipeline_mode<synchronous>, transform_indices = @transform_5, window_bounds = array<i64: 128, 256>}, {pipeline_mode = #tpu.pipeline_mode<synchronous>, transform_indices = @transform_6, window_bounds = array<i64: 1, 256>}, {transform_indices = @transform_7, window_bounds = array<i64: 1, 32, 128>}, {transform_indices = @transform_8, window_bounds = array<i64: 1, 32, 128>}]} {
    %c0_i32 = arith.constant 0 : i32
    %0 = arith.cmpi eq, %arg1, %c0_i32 : i32
    %1 = arith.extui %0 : i1 to i32
    %c0_i32_0 = arith.constant 0 : i32
    %2 = arith.cmpi ne, %1, %c0_i32_0 : i32
    scf.if %2 {
      %c0_i32_37 = arith.constant 0 : i32
      %c0_i32_38 = arith.constant 0 : i32
      %c0_i32_39 = arith.constant 0 : i32
      %c0_i32_40 = arith.constant 0 : i32
      %70 = tpu.memref_slice %arg2[%arg0, %c0_i32_39, %c0_i32_40] : memref<2x68x128xf32, #tpu.memory_space<any>> -> memref<1x36x128xf32, #tpu.memory_space<any>>
      %71 = tpu.memref_squeeze %70 : memref<1x36x128xf32, #tpu.memory_space<any>> -> memref<36x128xf32, #tpu.memory_space<any>>
      %c0_i32_41 = arith.constant 0 : i32
      %c0_i32_42 = arith.constant 0 : i32
      %72 = tpu.memref_slice %arg11[%c0_i32_37, %c0_i32_41, %c0_i32_42] : memref<2x36x128xf32, #tpu.memory_space<vmem>> -> memref<1x36x128xf32, #tpu.memory_space<vmem>>
      %73 = tpu.memref_squeeze %72 : memref<1x36x128xf32, #tpu.memory_space<vmem>> -> memref<36x128xf32, #tpu.memory_space<vmem>>
      %74 = tpu.memref_slice %arg12[%c0_i32_38] : memref<2x!tpu.dma_semaphore, #tpu.memory_space<semaphore_mem>> -> memref<1x!tpu.dma_semaphore, #tpu.memory_space<semaphore_mem>>
      %75 = tpu.memref_squeeze %74 : memref<1x!tpu.dma_semaphore, #tpu.memory_space<semaphore_mem>> -> memref<!tpu.dma_semaphore, #tpu.memory_space<semaphore_mem>>
      tpu.enqueue_dma source(%71 : memref<36x128xf32, #tpu.memory_space<any>>) target(%73 : memref<36x128xf32, #tpu.memory_space<vmem>>) target_semaphore(%75 : memref<!tpu.dma_semaphore, #tpu.memory_space<semaphore_mem>>)
    } else {
    }
    %c1_i32 = arith.constant 1 : i32
    %3 = arith.addi %arg1, %c1_i32 : i32
    %c2_i32 = arith.constant 2 : i32
    %4 = arith.cmpi slt, %3, %c2_i32 : i32
    %5 = arith.extui %4 : i1 to i32
    %c0_i32_1 = arith.constant 0 : i32
    %6 = arith.cmpi ne, %5, %c0_i32_1 : i32
    scf.if %6 {
      %c1_i32_37 = arith.constant 1 : i32
      %70 = arith.addi %arg1, %c1_i32_37 : i32
      %c1_i32_38 = arith.constant 1 : i32
      %71 = arith.addi %arg1, %c1_i32_38 : i32
      %c2_i32_39 = arith.constant 2 : i32
      %c0_i32_40 = arith.constant 0 : i32
      %72 = arith.cmpi eq, %c2_i32_39, %c0_i32_40 : i32
      %c1_i32_41 = arith.constant 1 : i32
      %73 = arith.select %72, %c1_i32_41, %c2_i32_39 : i32
      %74 = arith.remsi %71, %73 : i32
      %c0_i32_42 = arith.constant 0 : i32
      %75 = arith.cmpi ne, %74, %c0_i32_42 : i32
      %c0_i32_43 = arith.constant 0 : i32
      %76 = arith.cmpi slt, %74, %c0_i32_43 : i32
      %c0_i32_44 = arith.constant 0 : i32
      %77 = arith.cmpi slt, %73, %c0_i32_44 : i32
      %78 = arith.xori %76, %77 : i1
      %79 = arith.andi %78, %75 : i1
      %80 = arith.addi %74, %73 : i32
      %81 = arith.select %79, %80, %74 : i32
      %c32_i32_45 = arith.constant 32 : i32
      %82 = arith.muli %70, %c32_i32_45 : i32
      %c0_i32_46 = arith.constant 0 : i32
      %83 = tpu.memref_slice %arg2[%arg0, %82, %c0_i32_46] : memref<2x68x128xf32, #tpu.memory_space<any>> -> memref<1x36x128xf32, #tpu.memory_space<any>>
      %84 = tpu.memref_squeeze %83 : memref<1x36x128xf32, #tpu.memory_space<any>> -> memref<36x128xf32, #tpu.memory_space<any>>
      %c0_i32_47 = arith.constant 0 : i32
      %c0_i32_48 = arith.constant 0 : i32
      %85 = tpu.memref_slice %arg11[%81, %c0_i32_47, %c0_i32_48] : memref<2x36x128xf32, #tpu.memory_space<vmem>> -> memref<1x36x128xf32, #tpu.memory_space<vmem>>
      %86 = tpu.memref_squeeze %85 : memref<1x36x128xf32, #tpu.memory_space<vmem>> -> memref<36x128xf32, #tpu.memory_space<vmem>>
      %87 = tpu.memref_slice %arg12[%81] : memref<2x!tpu.dma_semaphore, #tpu.memory_space<semaphore_mem>> -> memref<1x!tpu.dma_semaphore, #tpu.memory_space<semaphore_mem>>
      %88 = tpu.memref_squeeze %87 : memref<1x!tpu.dma_semaphore, #tpu.memory_space<semaphore_mem>> -> memref<!tpu.dma_semaphore, #tpu.memory_space<semaphore_mem>>
      tpu.enqueue_dma source(%84 : memref<36x128xf32, #tpu.memory_space<any>>) target(%86 : memref<36x128xf32, #tpu.memory_space<vmem>>) target_semaphore(%88 : memref<!tpu.dma_semaphore, #tpu.memory_space<semaphore_mem>>)
    } else {
    }
    %c2_i32_2 = arith.constant 2 : i32
    %c0_i32_3 = arith.constant 0 : i32
    %7 = arith.cmpi eq, %c2_i32_2, %c0_i32_3 : i32
    %c1_i32_4 = arith.constant 1 : i32
    %8 = arith.select %7, %c1_i32_4, %c2_i32_2 : i32
    %9 = arith.remsi %arg1, %8 : i32
    %c0_i32_5 = arith.constant 0 : i32
    %10 = arith.cmpi ne, %9, %c0_i32_5 : i32
    %c0_i32_6 = arith.constant 0 : i32
    %11 = arith.cmpi slt, %9, %c0_i32_6 : i32
    %c0_i32_7 = arith.constant 0 : i32
    %12 = arith.cmpi slt, %8, %c0_i32_7 : i32
    %13 = arith.xori %11, %12 : i1
    %14 = arith.andi %13, %10 : i1
    %15 = arith.addi %9, %8 : i32
    %16 = arith.select %14, %15, %9 : i32
    %c32_i32 = arith.constant 32 : i32
    %17 = arith.muli %arg1, %c32_i32 : i32
    %c0_i32_8 = arith.constant 0 : i32
    %18 = tpu.memref_slice %arg2[%arg0, %17, %c0_i32_8] : memref<2x68x128xf32, #tpu.memory_space<any>> -> memref<1x36x128xf32, #tpu.memory_space<any>>
    %19 = tpu.memref_squeeze %18 : memref<1x36x128xf32, #tpu.memory_space<any>> -> memref<36x128xf32, #tpu.memory_space<any>>
    %c0_i32_9 = arith.constant 0 : i32
    %c0_i32_10 = arith.constant 0 : i32
    %20 = tpu.memref_slice %arg11[%16, %c0_i32_9, %c0_i32_10] : memref<2x36x128xf32, #tpu.memory_space<vmem>> -> memref<1x36x128xf32, #tpu.memory_space<vmem>>
    %21 = tpu.memref_squeeze %20 : memref<1x36x128xf32, #tpu.memory_space<vmem>> -> memref<36x128xf32, #tpu.memory_space<vmem>>
    %22 = tpu.memref_slice %arg12[%16] : memref<2x!tpu.dma_semaphore, #tpu.memory_space<semaphore_mem>> -> memref<1x!tpu.dma_semaphore, #tpu.memory_space<semaphore_mem>>
    %23 = tpu.memref_squeeze %22 : memref<1x!tpu.dma_semaphore, #tpu.memory_space<semaphore_mem>> -> memref<!tpu.dma_semaphore, #tpu.memory_space<semaphore_mem>>
    tpu.wait_dma2 semaphore(%23 : memref<!tpu.dma_semaphore, #tpu.memory_space<semaphore_mem>>) src(%19 : memref<36x128xf32, #tpu.memory_space<any>>) dst(%21 : memref<36x128xf32, #tpu.memory_space<vmem>>)
    %24 = arith.index_cast %16 : i32 to index
    %c0 = arith.constant 0 : index
    %c0_11 = arith.constant 0 : index
    %25 = vector.load %arg11[%24, %c0, %c0_11] : memref<2x36x128xf32, #tpu.memory_space<vmem>>, vector<1x32x128xf32>
    %26 = vector.shape_cast %25 : vector<1x32x128xf32> to vector<32x128xf32>
    %27 = arith.index_cast %16 : i32 to index
    %c2 = arith.constant 2 : index
    %c0_12 = arith.constant 0 : index
    %28 = vector.load %arg11[%27, %c2, %c0_12] : memref<2x36x128xf32, #tpu.memory_space<vmem>>, vector<1x32x128xf32>
    %29 = vector.shape_cast %28 : vector<1x32x128xf32> to vector<32x128xf32>
    %30 = arith.index_cast %16 : i32 to index
    %c4 = arith.constant 4 : index
    %c0_13 = arith.constant 0 : index
    %31 = vector.load %arg11[%30, %c4, %c0_13] : memref<2x36x128xf32, #tpu.memory_space<vmem>>, vector<1x32x128xf32>
    %32 = vector.shape_cast %31 : vector<1x32x128xf32> to vector<32x128xf32>
    %c0_14 = arith.constant 0 : index
    %c0_15 = arith.constant 0 : index
    %c0_16 = arith.constant 0 : index
    %33 = vector.load %arg3[%c0_14, %c0_15, %c0_16] : memref<1x32x128xf32, #tpu.memory_space<vmem>>, vector<1x32x128xf32>
    %34 = vector.shape_cast %33 : vector<1x32x128xf32> to vector<32x128xf32>
    %35 = tpu.concatenate %26, %29, %32, %34 in 1 : vector<32x128xf32>, vector<32x128xf32>, vector<32x128xf32>, vector<32x128xf32> -> vector<32x512xf32>
    %c0_17 = arith.constant 0 : index
    %c0_18 = arith.constant 0 : index
    %36 = vector.load %arg5[%c0_17, %c0_18] : memref<512x256xf32, #tpu.memory_space<vmem>>, vector<512x256xf32>
    %cst = arith.constant dense<0.000000e+00> : vector<32x256xf32>
    %37 = tpu.matmul %35, %36, %cst {dimension_numbers = #tpu.dot_dimension_numbers<[1], [0], [0], [1], [0, 0, 1, 1], [], []>} : vector<32x512xf32>, vector<512x256xf32>, vector<32x256xf32> -> vector<32x256xf32>
    %c0_19 = arith.constant 0 : index
    %c0_20 = arith.constant 0 : index
    %38 = vector.load %arg6[%c0_19, %c0_20] : memref<1x256xf32, #tpu.memory_space<vmem>>, vector<1x256xf32>
    %39 = vector.broadcast %38 : vector<1x256xf32> to vector<32x256xf32>
    %40 = arith.addf %37, %39 : vector<32x256xf32>
    %41 = vector.extract_strided_slice %40 {offsets = [0, 0], sizes = [32, 128], strides = [1, 1]} : vector<32x256xf32> to vector<32x128xf32>
    %42 = vector.extract_strided_slice %40 {offsets = [0, 128], sizes = [32, 128], strides = [1, 1]} : vector<32x256xf32> to vector<32x128xf32>
    %43 = arith.negf %41 : vector<32x128xf32>
    %44 = math.exp %43 : vector<32x128xf32>
    %cst_21 = arith.constant 1.000000e+00 : f32
    %45 = vector.broadcast %cst_21 : f32 to vector<32x128xf32>
    %46 = arith.addf %45, %44 : vector<32x128xf32>
    %47 = arith.divf %45, %46 : vector<32x128xf32>
    %48 = math.tanh %42 : vector<32x128xf32>
    %49 = arith.mulf %47, %48 : vector<32x128xf32>
    %c0_22 = arith.constant 0 : index
    %c0_23 = arith.constant 0 : index
    %50 = vector.load %arg7[%c0_22, %c0_23] : memref<128x256xf32, #tpu.memory_space<vmem>>, vector<128x256xf32>
    %cst_24 = arith.constant dense<0.000000e+00> : vector<32x256xf32>
    %51 = tpu.matmul %49, %50, %cst_24 {dimension_numbers = #tpu.dot_dimension_numbers<[1], [0], [0], [1], [0, 0, 1, 1], [], []>} : vector<32x128xf32>, vector<128x256xf32>, vector<32x256xf32> -> vector<32x256xf32>
    %c0_25 = arith.constant 0 : index
    %c0_26 = arith.constant 0 : index
    %52 = vector.load %arg8[%c0_25, %c0_26] : memref<1x256xf32, #tpu.memory_space<vmem>>, vector<1x256xf32>
    %53 = vector.broadcast %52 : vector<1x256xf32> to vector<32x256xf32>
    %54 = arith.addf %51, %53 : vector<32x256xf32>
    %55 = vector.extract_strided_slice %54 {offsets = [0, 0], sizes = [32, 128], strides = [1, 1]} : vector<32x256xf32> to vector<32x128xf32>
    %56 = vector.extract_strided_slice %54 {offsets = [0, 128], sizes = [32, 128], strides = [1, 1]} : vector<32x256xf32> to vector<32x128xf32>
    %c0_27 = arith.constant 0 : index
    %c0_28 = arith.constant 0 : index
    %c0_29 = arith.constant 0 : index
    %57 = vector.load %arg4[%c0_27, %c0_28, %c0_29] : memref<1x1x128xf32, #tpu.memory_space<vmem>>, vector<1x1x128xf32>
    %58 = vector.shape_cast %57 : vector<1x1x128xf32> to vector<1x128xf32>
    %59 = vector.broadcast %58 : vector<1x128xf32> to vector<32x128xf32>
    %60 = arith.subf %29, %59 : vector<32x128xf32>
    %61 = arith.addf %60, %55 : vector<32x128xf32>
    %cst_30 = arith.constant 0.707106769 : f32
    %62 = vector.broadcast %cst_30 : f32 to vector<32x128xf32>
    %63 = arith.mulf %61, %62 : vector<32x128xf32>
    %c0_31 = arith.constant 0 : index
    %c0_32 = arith.constant 0 : index
    %c0_33 = arith.constant 0 : index
    %64 = vector.load %arg9[%c0_31, %c0_32, %c0_33] : memref<1x32x128xf32, #tpu.memory_space<vmem>>, vector<1x32x128xf32>
    %65 = vector.shape_cast %64 : vector<1x32x128xf32> to vector<32x128xf32>
    %66 = vector.shape_cast %63 : vector<32x128xf32> to vector<1x32x128xf32>
    tpu.vector_store %arg9[%c0_31, %c0_32, %c0_33], %66 {strides = array<i32>} : memref<1x32x128xf32, #tpu.memory_space<vmem>>, vector<1x32x128xf32>,
    %c0_34 = arith.constant 0 : index
    %c0_35 = arith.constant 0 : index
    %c0_36 = arith.constant 0 : index
    %67 = vector.load %arg10[%c0_34, %c0_35, %c0_36] : memref<1x32x128xf32, #tpu.memory_space<vmem>>, vector<1x32x128xf32>
    %68 = vector.shape_cast %67 : vector<1x32x128xf32> to vector<32x128xf32>
    %69 = vector.shape_cast %56 : vector<32x128xf32> to vector<1x32x128xf32>
    tpu.vector_store %arg10[%c0_34, %c0_35, %c0_36], %69 {strides = array<i32>} : memref<1x32x128xf32, #tpu.memory_space<vmem>>, vector<1x32x128xf32>,
    return
  }
  func.func @transform_1(%arg0: i32, %arg1: i32) -> (i32, i32, i32) {
    %c0_i32 = arith.constant 0 : i32
    %c0_i32_0 = arith.constant 0 : i32
    return %arg0, %arg1, %c0_i32 : i32, i32, i32
  }
  func.func @transform_2(%arg0: i32, %arg1: i32) -> (i32, i32, i32) {
    %c0_i32 = arith.constant 0 : i32
    %c0_i32_0 = arith.constant 0 : i32
    %c0_i32_1 = arith.constant 0 : i32
    return %arg0, %c0_i32, %c0_i32_0 : i32, i32, i32
  }
  func.func @transform_3(%arg0: i32, %arg1: i32) -> (i32, i32) {
    %c0_i32 = arith.constant 0 : i32
    %c0_i32_0 = arith.constant 0 : i32
    %c0_i32_1 = arith.constant 0 : i32
    return %c0_i32, %c0_i32_0 : i32, i32
  }
  func.func @transform_4(%arg0: i32, %arg1: i32) -> (i32, i32) {
    %c0_i32 = arith.constant 0 : i32
    %c0_i32_0 = arith.constant 0 : i32
    %c0_i32_1 = arith.constant 0 : i32
    return %c0_i32, %c0_i32_0 : i32, i32
  }
  func.func @transform_5(%arg0: i32, %arg1: i32) -> (i32, i32) {
    %c0_i32 = arith.constant 0 : i32
    %c0_i32_0 = arith.constant 0 : i32
    %c0_i32_1 = arith.constant 0 : i32
    return %c0_i32, %c0_i32_0 : i32, i32
  }
  func.func @transform_6(%arg0: i32, %arg1: i32) -> (i32, i32) {
    %c0_i32 = arith.constant 0 : i32
    %c0_i32_0 = arith.constant 0 : i32
    %c0_i32_1 = arith.constant 0 : i32
    return %c0_i32, %c0_i32_0 : i32, i32
  }
  func.func @transform_7(%arg0: i32, %arg1: i32) -> (i32, i32, i32) {
    %c0_i32 = arith.constant 0 : i32
    %c0_i32_0 = arith.constant 0 : i32
    return %arg0, %arg1, %c0_i32 : i32, i32, i32
  }
  func.func @transform_8(%arg0: i32, %arg1: i32) -> (i32, i32, i32) {
    %c0_i32 = arith.constant 0 : i32
    %c0_i32_0 = arith.constant 0 : i32
    return %arg0, %arg1, %c0_i32 : i32, i32, i32
  }
}

</mosaic_0001>

<bundles_post_ra>
// kernel: tpu_custom_call.1
= control target key start
LH: loop header
LB: loop body
LE: loop exit
PB: predicated region body
PF: predicated region fallthrough
CT: control target
= control target key end

     0   :  { %s2386_s0 = inlined_call_operand.vmem [shape: f32[2,68,128], index: 0, kind: input, shape index: {}]   ;;  %s2387_s1 = inlined_call_operand.hbm [shape: f32[2,64,128], index: 1, kind: input, shape index: {}]   ;;  %s2388_s2 = inlined_call_operand.vmem [shape: f32[2,1,128], index: 2, kind: input, shape index: {}]   ;;  %s2389_s3 = inlined_call_operand.hbm [shape: f32[512,256], index: 3, kind: input, shape index: {}]   ;;  %s2390_s4 = inlined_call_operand.vmem [shape: f32[1,256], index: 4, kind: input, shape index: {}]   ;;  %s2391_s5 = inlined_call_operand.vmem [shape: f32[128,256], index: 5, kind: input, shape index: {}]   ;;  %s2392_s6 = inlined_call_operand.vmem [shape: f32[1,256], index: 6, kind: input, shape index: {}]   ;;  %s2393_s7 = inlined_call_operand.hbm [shape: f32[2,64,128], index: 7, kind: output, shape index: {0}]   ;;  %s2394_s8 = inlined_call_operand.hbm [shape: f32[2,64,128], index: 8, kind: output, shape index: {1}]  }
   0x1   :  { %2408 = sst [smem:[#allocation25_spill]] %s2389_s3 }
   0x2   :  { %2409 = sst [smem:[#allocation26_spill]] %s2392_s6 }
   0x3   :  { %2410 = sst [smem:[#allocation27_spill]] %s2393_s7 }
   0x4   :  { %2411 = sst [smem:[#allocation28_spill]] %s2394_s8 }
   0x5   :  { %14 = vsyncpa [#allocation5], 0 }
   0x6   :  { %16 = vsyncpa [#allocation5 + $0x1], 0 }
   0x7   :  { %17 = vsyncpa [#allocation8], 0 }
   0x8   :  { %18 = vsyncpa [#allocation6], 0 }
   0x9   :  { %20 = vsyncpa [#allocation6 + $0x1], 0 }
   0xa   :  { %21 = vsyncpa [#allocation11], 0 }
   0xb   :  { %23 = vsyncpa [#allocation11 + $0x1], 0  ;;  %s1911_s27 = smov 0   ;;  %s1913_s28 = smov 0  }
   0xc   :  { %s1915_s29 = smov 0   ;;  %s1917_s30 = smov 0  }
   0xd   :  { %s1919_s9 = smov 0   ;;  %s1921_s10 = smov 0  }
   0xe   :  { %s1923_s11 = smov 0   ;;  %s1925_s12 = smov 0  }
   0xf LB: > { %2412 = sst [smem:[#allocation19_spill]] %s1825_s27  ;;  %s1293_s13 = sadd.s32 4294967295, %s1853_s12   ;;  %s1853_s12 = sphi %s1925_s12, %s29_s12   ;;  %s1849_s11 = sphi %s1923_s11, %s2447_s11   ;;  %s1845_s10 = sphi %s1921_s10, %s2441_s10   ;;  %s1841_s9 = sphi %s1919_s9, %s2446_s9   ;;  %s1837_s30 = sphi %s1917_s30, %s2440_s30   ;;  %s1833_s29 = sphi %s1915_s29, %s2445_s29   ;;  %s1829_s28 = sphi %s1913_s28, %s2444_s28   ;;  %s1825_s27 = sphi %s1911_s27, %s2443_s27  }
  0x10   : > { %2413 = sst [smem:[#allocation20_spill]] %s1845_s10  ;;  %s1294_s14 = sadd.s32 4294967294, %s1853_s12  }
  0x11   : > { %p63_p0 = scmp.ne.s32.totalorder %s1829_s28, %s1825_s27  ;;  %p1955_p1 = scmp.eq.s32.totalorder %s1293_s13, 0 }
  0x12   : > { %p1959_p2 = scmp.eq.s32.totalorder %s1293_s13, 3  ;;  %p205_p3 = scmp.eq.s32.totalorder %s1294_s14, 3 }
  0x13   : > { %s2414_s15 = scalar_select %p1955_p1, 1, 0 }
  0x14   : > { %s2415_s16 = scalar_select %p1959_p2, 1, 0 }
  0x15   : > { %p1965_p4 = por %p1955_p1, %p63_p0  ;;  %p1295_p5 = scmp.ge.s32.totalorder %s1853_s12, 1 }
  0x16   : > { %p1970_p6 = por %p205_p3, %p63_p0  ;;  %p240_p7 = scmp.lt.s32.totalorder %s1853_s12, 5 }
  0x17   : > { %s2416_s17 = scalar_select %p1965_p4, 1, 0 }
  0x18   : > { %s2417_s18 = scalar_select %p1970_p6, 1, 0 }
  0x19   : > { %p1975_p8 = pnand %p1295_p5, %p240_p7  ;;  %s1855_s20 = smov [#allocation7]  }
  0x1a   : > { %2418 = sst [smem:[#allocation21_spill]] %s2417_s18  ;;  %s252_s21 = sshll.u32 %s1855_s20, 4  ;;  %s253_s21 = int_to_ptr.vmem [resolvable:$true] %s252_s21 }
  0x1b   : > { %s2419_s19 = scalar_select %p1975_p8, 1, 0 }
  0x1c   : > { %p1544_p9 = pneg %p1975_p8  ;;  %s2421_s3 = sld [smem:[#allocation25_spill]] }
  0x1e   : > { %p1983_p10 = pnand %p1544_p9, %p1955_p1 }
  0x20   : > { %p1661_p12 = pneg %p1983_p10 }
  0x22   : > { %s1659_s25 = scalar_lea.hbm %s2421_s3, 16384 }
  0x23   : > { %p1660_p11 = scmp.ne.s32.totalorder %s2421_s3, %s1659_s25  ;;  %p1666_p3 = scmp.lt.u32.totalorder %s1659_s25, %s2421_s3 }
  0x25   : > { %p1662_p13 = pnand %p1661_p12, %p1660_p11 }
  0x27   : > { %p1663_p0 = pneg %p1662_p13 }
  0x29   : > { %p1668_p5 = pnand %p1666_p3, %p1663_p0 }
  0x2b   : > { %1671 = shalt.err (!%p1668_p5)
}
  0x2c   : > { %s1672_s18 = scalar_lea.vmem %s253_s21, 16384  ;;  %p1680_p1 = scmp.lt.s32.totalorder %s253_s21, %s253_s21 }
  0x2d   : > { %p1673_p7 = scmp.ne.s32.totalorder %s253_s21, %s1672_s18  ;;  %p1681_p4 = scmp.lt.s32.totalorder %s1672_s18, %s1672_s18 }
  0x2f   : > { %p1675_p9 = pnand %p1673_p7, %p1661_p12  ;;  %p1682_p8 = por %p1681_p4, %p1680_p1 }
  0x31   : > { %p1676_p6 = pneg %p1675_p9 }
  0x33   : > { %p1683_p2 = pnand %p1682_p8, %p1676_p6 }
  0x35   : > { %1686 = shalt.err (!%p1683_p2)
}
  0x36   : > { %s1856_s23 = smov 256   ;;  %s1857_s24 = smov 16  }
  0x37   : > { %1547 = dma.hbm_to_vmem [thread:$0]  (!%p1983_p10), %s2421_s3, 16384, %s253_s21, [#allocation8], %s1856_s23, %s1856_s23, %s1857_s24  }
  0x38   : > { %s38_s18 = sadd.s32 1, %s1845_s10  ;;  %s41_s13 = sadd.s32 1, %s1849_s11 }
  0x39   : > { %p39_p1 = scmp.ge.s32.totalorder %s38_s18, 2  ;;  %s50_s14 = sadd.s32 1, %s1833_s29 }
  0x3a   : > { %p57_p2 = scmp.ne.s32.totalorder %s1833_s29, %s1829_s28  ;;  %p58_p4 = scmp.eq.s32.totalorder %s1853_s12, 0 }
  0x3b   : > { %s2449_s18 = smov (%p39_p1, %s38_s18), 0  ;;  %s2451_s13 = smov (!%p39_p1, %s41_s13), %s1849_s11 }
  0x3c   : > { %2422 = sst [smem:[#allocation22_spill]] %s2449_s18  ;;  %s46_s20 = ssub.s32 %s1845_s10, %s2449_s18 }
  0x3d   : > { %p43_p6 = scmp.ge.s32.totalorder %s2451_s13, 2  ;;  %p2423_p8 = scmp.ne.s32.totalorder %s2415_s16, 0 }
  0x3e   : > { %p2020_p10 = por %p58_p4, %p57_p2  ;;  %p1560_p12 = scmp.lt.s32.totalorder %s1853_s12, 4 }
  0x3f   : > { %p2016_p11 = por %p2423_p8, %p57_p2  ;;  %s2453_s13 = smov (%p43_p6, %s2451_s13), 0 }
  0x40   : > { %2427 = sst [smem:[#allocation24_spill]] %s2453_s13  ;;  %s275_s23 = sand.u32 1, %s1833_s29  }
  0x41   : > { %s2424_s22 = scalar_select %p2016_p11, 1, 0 }
  0x42   : > { %s1299_s24 = sshll.u32 %s1845_s10, 2  ;;  %s45_s25 = ssub.s32 %s1849_s11, %s2453_s13 }
  0x43   : > { %2425 = sst [smem:[#allocation23_spill]] %s2424_s22  ;;  %s47_s26 = sor.u32 %s46_s20, %s45_s25 }
  0x44   : > { %s1298_s3 = sshll.u32 %s275_s23, 5  ;;  %p48_p13 = scmp.eq.s32.totalorder %s47_s26, 0 }
  0x45   : > { %s1300_s16 = sshll.u32 %s1849_s11, 3  ;;  %s279_s18 = scalar_lea.vmem [#allocation4], %s1298_s3 }
  0x46   : > { %s288_s27 = sshll.u32 %s279_s18, 4  ;;  %s285_s8 = sadd.s32 %s1300_s16, %s1299_s24  ;;  %s2035_s27 = int_to_ptr.vmem [resolvable:$true] %s288_s27 }
  0x47   : > { %s2033_s7 = scalar_select %p48_p13, %s1833_s29, %s50_s14  }
  0x48   : > { %s1301_s22 = sshll.u32 %s285_s8, 7  ;;  %p2041_p0 = pnand %p1560_p12, %p2020_p10 }
  0x49   : > { %s2048_s20 = scalar_lea.hbm %s2387_s1, %s1301_s22  ;;  %s2050_s3 = scalar_lea.sflag [#allocation5], %s275_s23 }
  0x4a   : > { %s1687_s8 = scalar_lea.hbm %s2048_s20, 512  ;;  %p1689_p5 = pneg %p2041_p0 }
  0x4b   : > { %p1688_p3 = scmp.ne.s32.totalorder %s2048_s20, %s1687_s8  ;;  %s1692_s13 = scalar_lea.hbm %s2387_s1, 2048 }
  0x4c   : > { %p1693_p1 = scmp.lt.u32.totalorder %s2048_s20, %s2387_s1  ;;  %p1694_p2 = scmp.lt.u32.totalorder %s1692_s13, %s1687_s8 }
  0x4d   : > { %p1690_p7 = pnand %p1689_p5, %p1688_p3  ;;  %p1696_p6 = scmp.lt.u32.totalorder %s1687_s8, %s2048_s20 }
  0x4e   : > { %p1695_p4 = por %p1694_p2, %p1693_p1 }
  0x4f   : > { %p1691_p9 = pneg %p1690_p7 }
  0x50   : > { %p1697_p8 = por %p1696_p6, %p1695_p4 }
  0x52   : > { %p1698_p10 = pnand %p1697_p8, %p1691_p9 }
  0x54   : > { %1701 = shalt.err (!%p1698_p10)
}
  0x55   : > { %s1702_s21 = scalar_lea.vmem %s2035_s27, 512  ;;  %s1858_s23 = smov [#allocation4]  }
  0x56   : > { %p1703_p12 = scmp.ne.s32.totalorder %s2035_s27, %s1702_s21  ;;  %s1707_s24 = sshll.u32 %s1858_s23, 4  ;;  %s1708_s24 = int_to_ptr.vmem [resolvable:$false] %s1707_s24 }
  0x57   : > { %s1709_s25 = scalar_lea.vmem %s1708_s24, 1024  ;;  %p1710_p7 = scmp.lt.s32.totalorder %s2035_s27, %s1708_s24 }
  0x58   : > { %p1705_p13 = pnand %p1703_p12, %p1689_p5  ;;  %p1711_p1 = scmp.lt.s32.totalorder %s1709_s25, %s1702_s21 }
  0x5a   : > { %p1706_p3 = pneg %p1705_p13  ;;  %p1712_p2 = por %p1711_p1, %p1710_p7 }
  0x5c   : > { %p1713_p4 = pnand %p1712_p2, %p1706_p3 }
  0x5e   : > { %1716 = shalt.err (!%p1713_p4)
}
  0x5f   : > { %s1859_s26 = smov 128   ;;  %s1860_s16 = smov 8  }
  0x60   : > { %1551 = dma.hbm_to_vmem [thread:$0]  (!%p2041_p0), %s2048_s20, 512, %s2035_s27, %s2050_s3, %s1859_s26, %s1859_s26, %s1860_s16  }
  0x61   : > { %p2429_p5 = scmp.ne.s32.totalorder %s2419_s19, 0 }
  0x62   : > { %s2081_s8 = sand.u32 (!%p2429_p5), 1, %s1829_s28   ;;  %p2430_p9 = scmp.ne.s32.totalorder (!%p2429_p5), %s2416_s17, 0 }
  0x63   : > { %306 = sbr.rel (%p2429_p5) target bundleno = 732 (0x2dc), region = 44  ;;  %s1303_s18 = sshll.u32 (!%p2429_p5), %s2081_s8, 5 }
  0x64   : > { %s309_s10 = scalar_lea.sflag (!%p2429_p5), [#allocation5], %s2081_s8  ;;  %s2085_s13 = scalar_lea.vmem (!%p2429_p5), [#allocation4], %s1303_s18 }
  0x6a   : > { %1806 = dma.done.wait (%p2430_p9), %s309_s10, 512  }
  0x6b   : > { %1808 = vsyncadd (%p2430_p9), %s309_s10, 4294966784  ;;  %p2431_p0 = scmp.ne.s32.totalorder %s2414_s15, 0 }
  0x6d   : > { %1810 = dma.done.wait (%p2431_p0), [#allocation8], 16384  }
  0x6e   : > { %1812 = vsyncadd (%p2431_p0), [#allocation8], 4294950912  ;;  %p356_p6 = scmp.lt.s32.totalorder %s1841_s9, 1  ;;  %s2103_s3 = scalar_lea.vmem [#allocation9], %s1303_s18 }
  0x6f   : > { %s2105_s17 = scalar_lea.vmem [#allocation10], %s1303_s18  ;;  %p1307_p8 = scmp.ne.s32.totalorder %s1837_s30, 0 }
  0x70   : > { %s2097_s6 = scalar_select %p356_p6, %s1841_s9, 1 }
  0x71   : > { %364 = sbr.rel (%p1307_p8) target bundleno = 122 (0x7a), region = 56 }
  0x72   : > { %s358_s20 = scalar_lea.vmem %s2388_s2, %s2097_s6  ;;  %s365_s15 = smul.u32 (!%p1307_p8), 72, %s1841_s9 }
  0x74   : > { %s366_s21 = scalar_lea.vmem (!%p1307_p8), %s2386_s0, %s365_s15 }
  0x75   : > { %v404_v0 = vld [vmem:[%s366_s21] sm:$0xff] (!%p1307_p8)  ;;  %v406_v1 = vld [vmem:[%s366_s21 + $0x8] sm:$0xff] (!%p1307_p8)  ;;  %v408_v2 = vld [vmem:[%s366_s21 + $0x10] sm:$0xff] (!%p1307_p8) }
  0x76   : > { %405 = vst [vmem:[#allocation2] sm:$0xff] (!%p1307_p8), %v404_v0  ;;  %407 = vst [vmem:[#allocation2 + $0x8] sm:$0xff] (!%p1307_p8), %v406_v1  ;;  %v410_v3 = vld [vmem:[%s366_s21 + $0x18] sm:$0xff] (!%p1307_p8)  ;;  %v1308_v4 = vld [vmem:[%s366_s21 + $0x20] sm:$0xf] (!%p1307_p8) }
  0x77   : > { %409 = vst [vmem:[#allocation2 + $0x10] sm:$0xff] (!%p1307_p8), %v408_v2  ;;  %411 = vst [vmem:[#allocation2 + $0x18] sm:$0xff] (!%p1307_p8), %v410_v3 }
  0x78   : > { %422 = vst [vmem:[#allocation2 + $0x20] sm:$0xf] %v1308_v4 }
  0x79   : > { %426 = vsyncadd [#allocation3], 576 }
  0x7a PF: > { %s427_s23 = sadd.s32 1, %s1837_s30 }
  0x7b   : > { %p1309_p10 = scmp.ge.s32.totalorder %s427_s23, 2 }
  0x7c   : > { %p432_p12 = scmp.lt.s32.totalorder (!%p1309_p10), %s427_s23, 0  ;;  %s433_s24 = ssub.s32 (!%p1309_p10), 0, %s427_s23 }
  0x7d   : > { %431 = sbr.rel (%p1309_p10) target bundleno = 143 (0x8f), region = 97  ;;  %s1310_s25 = smin.u32 (!%p1309_p10), %s433_s24, %s427_s23 }
  0x7e   : > { %s1313_s26 = sshll.u32 (!%p1309_p10), %s1837_s30, 5  ;;  %s435_s16 = sand.u32 (!%p1309_p10), 1, %s1310_s25  }
  0x7f   : > { %s1175_s18 = smul.u32 (!%p1309_p10), 72, %s1841_s9  ;;  %s436_s10 = ssub.s32 (!%p1309_p10), 0, %s435_s16 }
  0x81   : > { %s1176_s27 = sadd.s32 (!%p1309_p10), %s1313_s26, %s1175_s18 }
  0x82   : > { %s1177_s22 = scalar_lea.vmem (!%p1309_p10), %s2386_s0, %s1176_s27 }
  0x83   : > { %v1315_v5 = vld [vmem:[%s1177_s22 + $0x20] sm:$0xff] (!%p1309_p10)  ;;  %v1316_v6 = vld [vmem:[%s1177_s22 + $0x28] sm:$0xff] (!%p1309_p10)  ;;  %v1317_v7 = vld [vmem:[%s1177_s22 + $0x30] sm:$0xff] (!%p1309_p10) }
  0x84   : > { %s2455_s10 = smov (!%p432_p12, %s436_s10), %s435_s16  ;;  %v1318_v8 = vld [vmem:[%s1177_s22 + $0x38] sm:$0xff]  ;;  %v1319_v9 = vld [vmem:[%s1177_s22 + $0x40] sm:$0xf] }
  0x85   : > { %p1312_p13 = scmp.lt.s32.totalorder %s2455_s10, 0  ;;  %s442_s19 = sadd.s32 2, %s2455_s10 }
  0x87   : > { %s2457_s19 = smov (!%p1312_p13, %s442_s19), %s2455_s10 }
  0x88   : > { %s448_s21 = smul.u32 40, %s2457_s19  ;;  %s450_s24 = scalar_lea.sflag [#allocation3], %s2457_s19 }
  0x8a   : > { %s449_s23 = scalar_lea.vmem [#allocation2], %s448_s21 }
  0x8b   : > { %489 = vst [vmem:[%s449_s23] sm:$0xff] %v1315_v5  ;;  %491 = vst [vmem:[%s449_s23 + $0x8] sm:$0xff] %v1316_v6 }
  0x8c   : > { %493 = vst [vmem:[%s449_s23 + $0x10] sm:$0xff] %v1317_v7  ;;  %495 = vst [vmem:[%s449_s23 + $0x18] sm:$0xff] %v1318_v8 }
  0x8d   : > { %1320 = vst [vmem:[%s449_s23 + $0x20] sm:$0xf] %v1319_v9 }
  0x8e   : > { %510 = vsyncadd %s450_s24, 576 }
  0x8f PF: > { %p511_p3 = scmp.lt.s32.totalorder %s1837_s30, 0  ;;  %s512_s25 = ssub.s32 0, %s1837_s30 }
  0x90   : > { %s1322_s26 = smin.u32 %s1837_s30, %s512_s25 }
  0x91   : > { %s514_s16 = sand.u32 1, %s1322_s26  }
  0x92   : > { %s515_s18 = ssub.s32 0, %s514_s16 }
  0x93   : > { %s2459_s18 = smov (!%p511_p3, %s515_s18), %s514_s16 }
  0x94   : > { %p1324_p7 = scmp.lt.s32.totalorder %s2459_s18, 0  ;;  %s521_s10 = sadd.s32 2, %s2459_s18 }
  0x96   : > { %s2461_s10 = smov (!%p1324_p7, %s521_s10), %s2459_s18 }
  0x97   : > { %s523_s27 = smul.u32 40, %s2461_s10  ;;  %s525_s14 = scalar_lea.sflag [#allocation3], %s2461_s10 }
  0x99   : > { %s2121_s15 = scalar_lea.vmem [#allocation2], %s523_s27 }
  0x9a   : > { %1813 = dma.done.wait %s525_s14, 576 }
  0x9b   : > { %1814 = vsyncadd %s525_s14, 4294966720  ;;  %v546_v10 = vld [vmem:[#allocation7 + $0x8] sm:$0xff]  ;;  %v548_v11 = vld [vmem:[#allocation7 + $0x18] sm:$0xff]  ;;  %s1332_s6 = sshll.u32 %s1837_s30, 2  ;;  %s1076_s21 = sshll.u32 %s2103_s3, 4  ;;  %s2301_s21 = int_to_ptr.vmem [resolvable:$true] %s1076_s21 }
  0x9c   : > { %v545_v12 = vld [vmem:[#allocation7] sm:$0xff]  ;;  %v1342_v13 = vpack.c.bf16 %v548_v11, %v546_v10  ;;  %v547_v14 = vld [vmem:[#allocation7 + $0x10] sm:$0xff]  ;;  %v610_v15 = vld [vmem:[#allocation7 + $0x208] sm:$0xff]  ;;  %s2434_s25 = sld [smem:[#allocation28_spill]]  ;;  %s2435_s10 = sld [smem:[#allocation27_spill]] }
  0x9d   : > { %v612_v16 = vld [vmem:[#allocation7 + $0x218] sm:$0xff]  ;;  %v1344_v17 = vpack.c.bf16 %v547_v14, %v545_v12  ;;  %v609_v19 = vld [vmem:[#allocation7 + $0x200] sm:$0xff]  ;;  %v611_v20 = vld [vmem:[#allocation7 + $0x210] sm:$0xff]  ;;  %s1061_s14 = scalar_lea.sflag [#allocation11], %s2081_s8 }
  0x9e   : > { %v1406_v18 = vpack.c.bf16 %v612_v16, %v610_v15  ;;  %v550_v21 = vld [vmem:[#allocation7 + $0x28] sm:$0xff]  ;;  %1343 = vmatprep.subr.bf16.mxu1 %v1342_v13  ;;  %v1408_v22 = vpack.c.bf16 %v611_v20, %v609_v19  ;;  %v552_v23 = vld [vmem:[#allocation7 + $0x38] sm:$0xff]  ;;  %v549_v24 = vld [vmem:[#allocation7 + $0x20] sm:$0xff] }
  0x9f   : > { %v551_v25 = vld [vmem:[#allocation7 + $0x30] sm:$0xff]  ;;  %1345 = vmatpush1.bf16.msra.mxu1 %v1344_v17  ;;  %v1346_v26 = vpack.c.bf16 %v552_v23, %v550_v21  ;;  %v614_v28 = vld [vmem:[#allocation7 + $0x228] sm:$0xff]  ;;  %v616_v29 = vld [vmem:[#allocation7 + $0x238] sm:$0xff] }
  0xa0   : > { %1407 = vmatprep.subr.bf16.mxu0 %v1406_v18  ;;  %v1348_v27 = vpack.c.bf16 %v551_v25, %v549_v24  ;;  %v613_v30 = vld [vmem:[#allocation7 + $0x220] sm:$0xff]  ;;  %v1410_v31 = vpack.c.bf16 %v616_v29, %v614_v28  ;;  %v615_v32 = vld [vmem:[#allocation7 + $0x230] sm:$0xff]  ;;  %v554_v33 = vld [vmem:[#allocation7 + $0x48] sm:$0xff] }
  0xa1   : > { %1409 = vmatpush1.bf16.msra.mxu0 %v1408_v22  ;;  %v556_v34 = vld [vmem:[#allocation7 + $0x58] sm:$0xff]  ;;  %1347 = vmatprep.subr.bf16.mxu1 %v1346_v26  ;;  %v1412_v35 = vpack.c.bf16 %v615_v32, %v613_v30  ;;  %v553_v37 = vld [vmem:[#allocation7 + $0x40] sm:$0xff]  ;;  %v555_v38 = vld [vmem:[#allocation7 + $0x50] sm:$0xff] }
  0xa2   : > { %v1350_v36 = vpack.c.bf16 %v556_v34, %v554_v33  ;;  %v618_v39 = vld [vmem:[#allocation7 + $0x248] sm:$0xff]  ;;  %1411 = vmatprep.subr.bf16.mxu0 %v1410_v31  ;;  %v620_v40 = vld [vmem:[#allocation7 + $0x258] sm:$0xff]  ;;  %v617_v41 = vld [vmem:[#allocation7 + $0x240] sm:$0xff]  ;;  %v1352_v43 = vpack.c.bf16 %v555_v38, %v553_v37 }
  0xa3   : > { %v619_v42 = vld [vmem:[#allocation7 + $0x250] sm:$0xff]  ;;  %1349 = vmatpush1.bf16.msra.mxu1 %v1348_v27  ;;  %v1414_v44 = vpack.c.bf16 %v620_v40, %v618_v39  ;;  %v558_v45 = vld [vmem:[#allocation7 + $0x68] sm:$0xff]  ;;  %v560_v46 = vld [vmem:[#allocation7 + $0x78] sm:$0xff] }
  0xa4   : > { %v557_v47 = vld [vmem:[#allocation7 + $0x60] sm:$0xff]  ;;  %1351 = vmatprep.subr.bf16.mxu1 %v1350_v36  ;;  %v1416_v48 = vpack.c.bf16 %v619_v42, %v617_v41  ;;  %v1354_v49 = vpack.c.bf16 %v560_v46, %v558_v45  ;;  %v559_v50 = vld [vmem:[#allocation7 + $0x70] sm:$0xff]  ;;  %v622_v51 = vld [vmem:[#allocation7 + $0x268] sm:$0xff] }
  0xa5   : > { %1413 = vmatpush1.bf16.msra.mxu0 %v1412_v35  ;;  %v624_v52 = vld [vmem:[#allocation7 + $0x278] sm:$0xff]  ;;  %v621_v54 = vld [vmem:[#allocation7 + $0x260] sm:$0xff]  ;;  %v623_v55 = vld [vmem:[#allocation7 + $0x270] sm:$0xff]  ;;  %v1356_v58 = vpack.c.bf16 %v559_v50, %v557_v47 }
  0xa6   : > { %1415 = vmatprep.subr.bf16.mxu0 %v1414_v44  ;;  %v1418_v53 = vpack.c.bf16 %v624_v52, %v622_v51  ;;  %v562_v56 = vld [vmem:[#allocation7 + $0x88] sm:$0xff]  ;;  %v564_v57 = vld [vmem:[#allocation7 + $0x98] sm:$0xff]  ;;  %v1420_v61 = vpack.c.bf16 %v623_v55, %v621_v54  ;;  %v561_v63 = vld [vmem:[#allocation7 + $0x80] sm:$0xff] }
  0xa7   : > { %1353 = vmatpush1.bf16.msra.mxu1 %v1352_v43  ;;  %v626_v59 = vld [vmem:[#allocation7 + $0x288] sm:$0xff]  ;;  %v628_v60 = vld [vmem:[#allocation7 + $0x298] sm:$0xff]  ;;  %v1358_v62 = vpack.c.bf16 %v564_v57, %v562_v56  ;;  %v563_v0 = vld [vmem:[#allocation7 + $0x90] sm:$0xff] }
  0xa8   : > { %1355 = vmatprep.subr.bf16.mxu1 %v1354_v49  ;;  %v625_v1 = vld [vmem:[#allocation7 + $0x280] sm:$0xff]  ;;  %v1422_v2 = vpack.c.bf16 %v628_v60, %v626_v59  ;;  %v627_v3 = vld [vmem:[#allocation7 + $0x290] sm:$0xff]  ;;  %v566_v4 = vld [vmem:[#allocation7 + $0xa8] sm:$0xff]  ;;  %v1360_v8 = vpack.c.bf16 %v563_v0, %v561_v63 }
  0xa9   : > { %1417 = vmatpush1.bf16.msra.mxu0 %v1416_v48  ;;  %v568_v5 = vld [vmem:[#allocation7 + $0xb8] sm:$0xff]  ;;  %v630_v6 = vld [vmem:[#allocation7 + $0x2a8] sm:$0xff]  ;;  %v1424_v9 = vpack.c.bf16 %v627_v3, %v625_v1  ;;  %v565_v11 = vld [vmem:[#allocation7 + $0xa0] sm:$0xff] }
  0xaa   : > { %1419 = vmatprep.subr.bf16.mxu0 %v1418_v53  ;;  %v632_v7 = vld [vmem:[#allocation7 + $0x2b8] sm:$0xff]  ;;  %v1362_v10 = vpack.c.bf16 %v568_v5, %v566_v4  ;;  %v567_v12 = vld [vmem:[#allocation7 + $0xb0] sm:$0xff]  ;;  %v629_v13 = vld [vmem:[#allocation7 + $0x2a0] sm:$0xff] }
  0xab   : > { %1357 = vmatpush1.bf16.msra.mxu1 %v1356_v58  ;;  %v1426_v14 = vpack.c.bf16 %v632_v7, %v630_v6  ;;  %v631_v15 = vld [vmem:[#allocation7 + $0x2b0] sm:$0xff]  ;;  %v570_v16 = vld [vmem:[#allocation7 + $0xc8] sm:$0xff]  ;;  %v572_v17 = vld [vmem:[#allocation7 + $0xd8] sm:$0xff]  ;;  %v1364_v20 = vpack.c.bf16 %v567_v12, %v565_v11 }
  0xac   : > { %1359 = vmatprep.subr.bf16.mxu1 %v1358_v62  ;;  %v634_v18 = vld [vmem:[#allocation7 + $0x2c8] sm:$0xff]  ;;  %v636_v19 = vld [vmem:[#allocation7 + $0x2d8] sm:$0xff]  ;;  %v1428_v21 = vpack.c.bf16 %v631_v15, %v629_v13  ;;  %v1366_v22 = vpack.c.bf16 %v572_v17, %v570_v16  ;;  %v569_v23 = vld [vmem:[#allocation7 + $0xc0] sm:$0xff] }
  0xad   : > { %1421 = vmatpush1.bf16.msra.mxu0 %v1420_v61  ;;  %v571_v24 = vld [vmem:[#allocation7 + $0xd0] sm:$0xff]  ;;  %v633_v25 = vld [vmem:[#allocation7 + $0x2c0] sm:$0xff]  ;;  %v1430_v26 = vpack.c.bf16 %v636_v19, %v634_v18  ;;  %v574_v28 = vld [vmem:[#allocation7 + $0xe8] sm:$0xff] }
  0xae   : > { %1423 = vmatprep.subr.bf16.mxu0 %v1422_v2  ;;  %v635_v27 = vld [vmem:[#allocation7 + $0x2d0] sm:$0xff]  ;;  %v576_v29 = vld [vmem:[#allocation7 + $0xf8] sm:$0xff]  ;;  %v638_v30 = vld [vmem:[#allocation7 + $0x2e8] sm:$0xff]  ;;  %v1368_v32 = vpack.c.bf16 %v571_v24, %v569_v23 }
  0xaf   : > { %1361 = vmatpush1.bf16.msra.mxu1 %v1360_v8  ;;  %v640_v31 = vld [vmem:[#allocation7 + $0x2f8] sm:$0xff]  ;;  %v1432_v33 = vpack.c.bf16 %v635_v27, %v633_v25  ;;  %v1370_v34 = vpack.c.bf16 %v576_v29, %v574_v28  ;;  %v573_v35 = vld [vmem:[#allocation7 + $0xe0] sm:$0xff]  ;;  %v575_v36 = vld [vmem:[#allocation7 + $0xf0] sm:$0xff] }
  0xb0   : > { %1363 = vmatprep.subr.bf16.mxu1 %v1362_v10  ;;  %v637_v37 = vld [vmem:[#allocation7 + $0x2e0] sm:$0xff]  ;;  %v1434_v38 = vpack.c.bf16 %v640_v31, %v638_v30  ;;  %v639_v39 = vld [vmem:[#allocation7 + $0x2f0] sm:$0xff]  ;;  %v578_v40 = vld [vmem:[#allocation7 + $0x108] sm:$0xff]  ;;  %v1372_v44 = vpack.c.bf16 %v575_v36, %v573_v35 }
  0xb1   : > { %1425 = vmatpush1.bf16.msra.mxu0 %v1424_v9  ;;  %v580_v41 = vld [vmem:[#allocation7 + $0x118] sm:$0xff]  ;;  %v642_v42 = vld [vmem:[#allocation7 + $0x308] sm:$0xff]  ;;  %v1436_v45 = vpack.c.bf16 %v639_v39, %v637_v37  ;;  %v577_v47 = vld [vmem:[#allocation7 + $0x100] sm:$0xff] }
  0xb2   : > { %1427 = vmatprep.subr.bf16.mxu0 %v1426_v14  ;;  %v644_v43 = vld [vmem:[#allocation7 + $0x318] sm:$0xff]  ;;  %v1374_v46 = vpack.c.bf16 %v580_v41, %v578_v40  ;;  %v579_v48 = vld [vmem:[#allocation7 + $0x110] sm:$0xff]  ;;  %v641_v49 = vld [vmem:[#allocation7 + $0x300] sm:$0xff] }
  0xb3   : > { %1365 = vmatpush1.bf16.msra.mxu1 %v1364_v20  ;;  %v1438_v50 = vpack.c.bf16 %v644_v43, %v642_v42  ;;  %v643_v51 = vld [vmem:[#allocation7 + $0x310] sm:$0xff]  ;;  %v582_v52 = vld [vmem:[#allocation7 + $0x128] sm:$0xff]  ;;  %v584_v53 = vld [vmem:[#allocation7 + $0x138] sm:$0xff]  ;;  %v1376_v56 = vpack.c.bf16 %v579_v48, %v577_v47 }
  0xb4   : > { %1367 = vmatprep.subr.bf16.mxu1 %v1366_v22  ;;  %v646_v54 = vld [vmem:[#allocation7 + $0x328] sm:$0xff]  ;;  %v648_v55 = vld [vmem:[#allocation7 + $0x338] sm:$0xff]  ;;  %v1440_v57 = vpack.c.bf16 %v643_v51, %v641_v49  ;;  %v1378_v58 = vpack.c.bf16 %v584_v53, %v582_v52  ;;  %v581_v59 = vld [vmem:[#allocation7 + $0x120] sm:$0xff] }
  0xb5   : > { %1429 = vmatpush1.bf16.msra.mxu0 %v1428_v21  ;;  %v583_v60 = vld [vmem:[#allocation7 + $0x130] sm:$0xff]  ;;  %v645_v61 = vld [vmem:[#allocation7 + $0x320] sm:$0xff]  ;;  %v1442_v62 = vpack.c.bf16 %v648_v55, %v646_v54  ;;  %v586_v0 = vld [vmem:[#allocation7 + $0x148] sm:$0xff] }
  0xb6   : > { %1431 = vmatprep.subr.bf16.mxu0 %v1430_v26  ;;  %v647_v63 = vld [vmem:[#allocation7 + $0x330] sm:$0xff]  ;;  %v588_v1 = vld [vmem:[#allocation7 + $0x158] sm:$0xff]  ;;  %v650_v2 = vld [vmem:[#allocation7 + $0x348] sm:$0xff]  ;;  %v1380_v4 = vpack.c.bf16 %v583_v60, %v581_v59 }
  0xb7   : > { %1369 = vmatpush1.bf16.msra.mxu1 %v1368_v32  ;;  %v652_v3 = vld [vmem:[#allocation7 + $0x358] sm:$0xff]  ;;  %v1444_v5 = vpack.c.bf16 %v647_v63, %v645_v61  ;;  %v1382_v6 = vpack.c.bf16 %v588_v1, %v586_v0  ;;  %v585_v7 = vld [vmem:[#allocation7 + $0x140] sm:$0xff]  ;;  %v587_v8 = vld [vmem:[#allocation7 + $0x150] sm:$0xff] }
  0xb8   : > { %1371 = vmatprep.subr.bf16.mxu1 %v1370_v34  ;;  %v649_v9 = vld [vmem:[#allocation7 + $0x340] sm:$0xff]  ;;  %v1446_v10 = vpack.c.bf16 %v652_v3, %v650_v2  ;;  %v651_v11 = vld [vmem:[#allocation7 + $0x350] sm:$0xff]  ;;  %v590_v12 = vld [vmem:[#allocation7 + $0x168] sm:$0xff]  ;;  %v1384_v16 = vpack.c.bf16 %v587_v8, %v585_v7 }
  0xb9   : > { %1433 = vmatpush1.bf16.msra.mxu0 %v1432_v33  ;;  %v592_v13 = vld [vmem:[#allocation7 + $0x178] sm:$0xff]  ;;  %v654_v14 = vld [vmem:[#allocation7 + $0x368] sm:$0xff]  ;;  %v589_v17 = vld [vmem:[#allocation7 + $0x160] sm:$0xff]  ;;  %v1448_v18 = vpack.c.bf16 %v651_v11, %v649_v9 }
  0xba   : > { %1435 = vmatprep.subr.bf16.mxu0 %v1434_v38  ;;  %v656_v15 = vld [vmem:[#allocation7 + $0x378] sm:$0xff]  ;;  %v1386_v19 = vpack.c.bf16 %v592_v13, %v590_v12  ;;  %v591_v20 = vld [vmem:[#allocation7 + $0x170] sm:$0xff]  ;;  %v653_v21 = vld [vmem:[#allocation7 + $0x360] sm:$0xff] }
  0xbb   : > { %1373 = vmatpush1.bf16.msra.mxu1 %v1372_v44  ;;  %v655_v22 = vld [vmem:[#allocation7 + $0x370] sm:$0xff]  ;;  %v1450_v23 = vpack.c.bf16 %v656_v15, %v654_v14  ;;  %v594_v24 = vld [vmem:[#allocation7 + $0x188] sm:$0xff]  ;;  %v596_v25 = vld [vmem:[#allocation7 + $0x198] sm:$0xff]  ;;  %v1388_v30 = vpack.c.bf16 %v591_v20, %v589_v17 }
  0xbc   : > { %1375 = vmatprep.subr.bf16.mxu1 %v1374_v46  ;;  %v2124_v26 = vld [vmem:[%s2121_s15 + $0x2] sm:$0xff]  ;;  %v658_v27 = vld [vmem:[#allocation7 + $0x388] sm:$0xff]  ;;  %v1452_v31 = vpack.c.bf16 %v655_v22, %v653_v21  ;;  %v1390_v32 = vpack.c.bf16 %v596_v25, %v594_v24 }
  0xbd   : > { %1437 = vmatpush1.bf16.msra.mxu0 %v1436_v45  ;;  %v660_v28 = vld [vmem:[#allocation7 + $0x398] sm:$0xff]  ;;  %749 = vmatprep.mubr.f32.mxu1 %v2124_v26  ;;  %v541_v29 = vld [vmem:[%s2085_s13] sm:$0xff]  ;;  %v595_v34 = vld [vmem:[#allocation7 + $0x190] sm:$0xff] }
  0xbe   : > { %1439 = vmatprep.subr.bf16.mxu0 %v1438_v50  ;;  %838 = vmatprep.mubr.f32.mxu0 %v541_v29  ;;  %v593_v33 = vld [vmem:[#allocation7 + $0x180] sm:$0xff]  ;;  %v1454_v36 = vpack.c.bf16 %v660_v28, %v658_v27  ;;  %v659_v37 = vld [vmem:[#allocation7 + $0x390] sm:$0xff]  ;;  %v598_v38 = vld [vmem:[#allocation7 + $0x1a8] sm:$0xff] }
  0xbf   : > { %1377 = vmatpush1.bf16.msra.mxu1 %v1376_v56  ;;  %v657_v35 = vld [vmem:[#allocation7 + $0x380] sm:$0xff]  ;;  %v600_v39 = vld [vmem:[#allocation7 + $0x1b8] sm:$0xff]  ;;  %v662_v40 = vld [vmem:[#allocation7 + $0x3a8] sm:$0xff]  ;;  %v1392_v42 = vpack.c.bf16 %v595_v34, %v593_v33 }
  0xc0   : > { %1379 = vmatprep.subr.bf16.mxu1 %v1378_v58  ;;  %v664_v41 = vld [vmem:[#allocation7 + $0x3b8] sm:$0xff]  ;;  %v1456_v43 = vpack.c.bf16 %v659_v37, %v657_v35  ;;  %v1394_v44 = vpack.c.bf16 %v600_v39, %v598_v38  ;;  %v597_v45 = vld [vmem:[#allocation7 + $0x1a0] sm:$0xff]  ;;  %v599_v46 = vld [vmem:[#allocation7 + $0x1b0] sm:$0xff] }
  0xc1   : > { %1441 = vmatpush1.bf16.msra.mxu0 %v1440_v57  ;;  %v661_v47 = vld [vmem:[#allocation7 + $0x3a0] sm:$0xff]  ;;  %v1458_v48 = vpack.c.bf16 %v664_v41, %v662_v40  ;;  %v663_v49 = vld [vmem:[#allocation7 + $0x3b0] sm:$0xff]  ;;  %v602_v50 = vld [vmem:[#allocation7 + $0x1c8] sm:$0xff]  ;;  %v1396_v54 = vpack.c.bf16 %v599_v46, %v597_v45 }
  0xc2   : > { %1443 = vmatprep.subr.bf16.mxu0 %v1442_v62  ;;  %v604_v51 = vld [vmem:[#allocation7 + $0x1d8] sm:$0xff]  ;;  %v666_v52 = vld [vmem:[#allocation7 + $0x3c8] sm:$0xff]  ;;  %v1460_v55 = vpack.c.bf16 %v663_v49, %v661_v47  ;;  %v601_v57 = vld [vmem:[#allocation7 + $0x1c0] sm:$0xff] }
  0xc3   : > { %1381 = vmatpush1.bf16.msra.mxu1 %v1380_v4  ;;  %v668_v53 = vld [vmem:[#allocation7 + $0x3d8] sm:$0xff]  ;;  %v1398_v56 = vpack.c.bf16 %v604_v51, %v602_v50  ;;  %v603_v58 = vld [vmem:[#allocation7 + $0x1d0] sm:$0xff]  ;;  %v665_v59 = vld [vmem:[#allocation7 + $0x3c0] sm:$0xff] }
  0xc4   : > { %1383 = vmatprep.subr.bf16.mxu1 %v1382_v6  ;;  %v1462_v60 = vpack.c.bf16 %v668_v53, %v666_v52  ;;  %v667_v61 = vld [vmem:[#allocation7 + $0x3d0] sm:$0xff]  ;;  %v606_v62 = vld [vmem:[#allocation7 + $0x1e8] sm:$0xff]  ;;  %v608_v63 = vld [vmem:[#allocation7 + $0x1f8] sm:$0xff]  ;;  %v1400_v2 = vpack.c.bf16 %v603_v58, %v601_v57 }
  0xc5   : > { %1445 = vmatpush1.bf16.msra.mxu0 %v1444_v5  ;;  %v670_v0 = vld [vmem:[#allocation7 + $0x3e8] sm:$0xff]  ;;  %v672_v1 = vld [vmem:[#allocation7 + $0x3f8] sm:$0xff]  ;;  %v1464_v3 = vpack.c.bf16 %v667_v61, %v665_v59  ;;  %v1402_v4 = vpack.c.bf16 %v608_v63, %v606_v62  ;;  %v605_v5 = vld [vmem:[#allocation7 + $0x1e0] sm:$0xff] }
  0xc6   : > { %1447 = vmatprep.subr.bf16.mxu0 %v1446_v10  ;;  %v607_v6 = vld [vmem:[#allocation7 + $0x1f0] sm:$0xff]  ;;  %v1466_v7 = vpack.c.bf16 %v672_v1, %v670_v0  ;;  %v669_v8 = vld [vmem:[#allocation7 + $0x3e0] sm:$0xff]  ;;  %v542_v15 = vld [vmem:[%s2085_s13 + $0x8] sm:$0xff] }
  0xc7   : > { %1385 = vmatpush1.bf16.msra.mxu1 %v1384_v16  ;;  %v671_v9 = vld [vmem:[#allocation7 + $0x3f0] sm:$0xff]  ;;  %v1404_v10 = vpack.c.bf16 %v607_v6, %v605_v5  ;;  %v2131_v14 = vld [vmem:[%s2121_s15 + $0xa] sm:$0xff] }
  0xc8   : > { %1387 = vmatprep.subr.bf16.mxu1 %v1386_v19  ;;  %v1468_v11 = vpack.c.bf16 %v671_v9, %v669_v8  ;;  %v529_v12 = vld [vmem:[%s2121_s15] sm:$0xff]  ;;  %v530_v16 = vld [vmem:[%s2121_s15 + $0x8] sm:$0xff]  ;;  %v531_v20 = vld [vmem:[%s2121_s15 + $0x10] sm:$0xff] }
  0xc9   : > { %1449 = vmatpush1.bf16.msra.mxu0 %v1448_v18  ;;  %v537_v13 = vld [vmem:[%s2121_s15 + $0x4] sm:$0xff]  ;;  %v538_v17 = vld [vmem:[%s2121_s15 + $0xc] sm:$0xff]  ;;  %v539_v21 = vld [vmem:[%s2121_s15 + $0x14] sm:$0xff] }
  0xca   : > { %1451 = vmatprep.subr.bf16.mxu0 %v1450_v23  ;;  %v2138_v18 = vld [vmem:[%s2121_s15 + $0x12] sm:$0xff]  ;;  %v2145_v22 = vld [vmem:[%s2121_s15 + $0x1a] sm:$0xff] }
  0xcb   : > { %1389 = vmatpush1.bf16.msra.mxu1 %v1388_v30  ;;  %v543_v19 = vld [vmem:[%s2085_s13 + $0x10] sm:$0xff]  ;;  %v544_v23 = vld [vmem:[%s2085_s13 + $0x18] sm:$0xff]  ;;  %v898_v28 = vld [vmem:[%s2391_s5 + $0x18] sm:$0xff] }
  0xcc   : > { %1391 = vmatprep.subr.bf16.mxu1 %v1390_v32  ;;  %v532_v24 = vld [vmem:[%s2121_s15 + $0x18] sm:$0xff]  ;;  %v896_v27 = vld [vmem:[%s2391_s5 + $0x8] sm:$0xff]  ;;  %v901_v37 = vld [vmem:[%s2391_s5 + $0x30] sm:$0xff] }
  0xcd   : > { %1453 = vmatpush1.bf16.msra.mxu0 %v1452_v31  ;;  %v540_v25 = vld [vmem:[%s2121_s15 + $0x1c] sm:$0xff]  ;;  %v1470_v29 = vpack.c.bf16 %v898_v28, %v896_v27  ;;  %v897_v31 = vld [vmem:[%s2391_s5 + $0x10] sm:$0xff]  ;;  %s2432_s15 = sld [smem:[#allocation26_spill]] }
  0xce   : > { %1455 = vmatprep.subr.bf16.mxu0 %v1454_v36  ;;  %v895_v30 = vld [vmem:[%s2391_s5] sm:$0xff]  ;;  %v900_v33 = vld [vmem:[%s2391_s5 + $0x28] sm:$0xff]  ;;  %v902_v34 = vld [vmem:[%s2391_s5 + $0x38] sm:$0xff] }
  0xcf   : > { %1393 = vmatpush1.bf16.msra.mxu1 %v1392_v42  ;;  %v1472_v32 = vpack.c.bf16 %v897_v31, %v895_v30  ;;  %v1474_v35 = vpack.c.bf16 %v902_v34, %v900_v33  ;;  %v899_v36 = vld [vmem:[%s2391_s5 + $0x20] sm:$0xff]  ;;  %v904_v39 = vld [vmem:[%s2391_s5 + $0x48] sm:$0xff]  ;;  %v906_v40 = vld [vmem:[%s2391_s5 + $0x58] sm:$0xff] }
  0xd0   : > { %1395 = vmatprep.subr.bf16.mxu1 %v1394_v44  ;;  %v1476_v38 = vpack.c.bf16 %v901_v37, %v899_v36  ;;  %v1478_v41 = vpack.c.bf16 %v906_v40, %v904_v39  ;;  %v903_v42 = vld [vmem:[%s2391_s5 + $0x40] sm:$0xff]  ;;  %v908_v45 = vld [vmem:[%s2391_s5 + $0x68] sm:$0xff]  ;;  %v910_v46 = vld [vmem:[%s2391_s5 + $0x78] sm:$0xff] }
  0xd1   : > { %1457 = vmatpush1.bf16.msra.mxu0 %v1456_v43  ;;  %v905_v43 = vld [vmem:[%s2391_s5 + $0x50] sm:$0xff]  ;;  %v1482_v47 = vpack.c.bf16 %v910_v46, %v908_v45  ;;  %v912_v51 = vld [vmem:[%s2391_s5 + $0x88] sm:$0xff]  ;;  %v914_v52 = vld [vmem:[%s2391_s5 + $0x98] sm:$0xff] }
  0xd2   : > { %1459 = vmatprep.subr.bf16.mxu0 %v1458_v48  ;;  %v1480_v44 = vpack.c.bf16 %v905_v43, %v903_v42  ;;  %v907_v48 = vld [vmem:[%s2391_s5 + $0x60] sm:$0xff]  ;;  %v909_v49 = vld [vmem:[%s2391_s5 + $0x70] sm:$0xff]  ;;  %v1486_v53 = vpack.c.bf16 %v914_v52, %v912_v51  ;;  %v916_v57 = vld [vmem:[%s2391_s5 + $0xa8] sm:$0xff] }
  0xd3   : > { %1397 = vmatpush1.bf16.msra.mxu1 %v1396_v54  ;;  %v1484_v50 = vpack.c.bf16 %v909_v49, %v907_v48  ;;  %v911_v54 = vld [vmem:[%s2391_s5 + $0x80] sm:$0xff]  ;;  %v918_v58 = vld [vmem:[%s2391_s5 + $0xb8] sm:$0xff]  ;;  %v917_v61 = vld [vmem:[%s2391_s5 + $0xb0] sm:$0xff] }
  0xd4   : > { %1399 = vmatprep.subr.bf16.mxu1 %v1398_v56  ;;  %v1490_v59 = vpack.c.bf16 %v918_v58, %v916_v57  ;;  %v920_v63 = vld [vmem:[%s2391_s5 + $0xc8] sm:$0xff]  ;;  %v922_v0 = vld [vmem:[%s2391_s5 + $0xd8] sm:$0xff]  ;;  %v923_v8 = vld [vmem:[%s2391_s5 + $0xe0] sm:$0xff] }
  0xd5   : > { %1461 = vmatpush1.bf16.msra.mxu0 %v1460_v55  ;;  %v913_v55 = vld [vmem:[%s2391_s5 + $0x90] sm:$0xff]  ;;  %v1494_v1 = vpack.c.bf16 %v922_v0, %v920_v63  ;;  %v924_v5 = vld [vmem:[%s2391_s5 + $0xe8] sm:$0xff]  ;;  %v926_v6 = vld [vmem:[%s2391_s5 + $0xf8] sm:$0xff] }
  0xd6   : > { %1463 = vmatprep.subr.bf16.mxu0 %v1462_v60  ;;  %v1488_v56 = vpack.c.bf16 %v913_v55, %v911_v54  ;;  %v915_v60 = vld [vmem:[%s2391_s5 + $0xa0] sm:$0xff]  ;;  %v925_v9 = vld [vmem:[%s2391_s5 + $0xf0] sm:$0xff] }
  0xd7   : > { %1401 = vmatpush1.bf16.msra.mxu1 %v1400_v2  ;;  %v1492_v62 = vpack.c.bf16 %v917_v61, %v915_v60  ;;  %v919_v2 = vld [vmem:[%s2391_s5 + $0xc0] sm:$0xff] }
  0xd8   : > { %1403 = vmatprep.subr.bf16.mxu1 %v1402_v4 }
  0xd9   : > { %1465 = vmatpush1.bf16.msra.mxu0 %v1464_v3  ;;  %v921_v3 = vld [vmem:[%s2391_s5 + $0xd0] sm:$0xff] }
  0xda   : > { %1467 = vmatprep.subr.bf16.mxu0 %v1466_v7  ;;  %v1496_v4 = vpack.c.bf16 %v921_v3, %v919_v2  ;;  %v1498_v7 = vpack.c.bf16 %v926_v6, %v924_v5 }
  0xdb   : > { %1405 = vmatpush1.bf16.msra.mxu1 %v1404_v10  ;;  %v1500_v10 = vpack.c.bf16 %v925_v9, %v923_v8 }
  0xdc   : > { %1502 = vmatprep.subr.bf16.mxu1 %v1470_v29 }
  0xdd   : > { %1469 = vmatpush1.bf16.msra.mxu0 %v1468_v11  ;;  %v1861_v11 = vmov 0.0  }
  0xde   : > { %750 = vmatmul.mubr.f32.vlgmr.msra.gmra.mrb[0].mxu1 %v529_v12  ;;  %1471 = vmatprep.subr.bf16.mxu0 %v1470_v29  ;;  %v675_v12 = vlaneseq }
  0xdf   : > { %755 = vmatprep.mubr.f32.mxu1 %v2131_v14  ;;  %1510 = vmatpush1.bf16.msra.mxu1 %v1472_v32 }
  0xe0   : > { %839 = vmatmul.mubr.f32.vlgmr.msra.gmra.mrb[0].mxu0 %v537_v13  ;;  %1503 = vmatprep.subr.bf16.mxu1 %v1474_v35  ;;  %v2249_v13 = vshrl.u32 %v675_v12, 7 }
  0xe1   : > { %844 = vmatprep.mubr.f32.mxu0 %v542_v15  ;;  %1473 = vmatpush1.bf16.msra.mxu0 %v1472_v32 }
  0xe2   : > { %756 = vmatmul.mubr.f32.gmra.mrb[2].mxu1 %v530_v16  ;;  %1475 = vmatprep.subr.bf16.mxu0 %v1474_v35  ;;  %v677_v15 = vsub.s32 0, %v2249_v13  ;;  %v673_v16 = vld [vmem:[%s2390_s4] sm:$0x3] }
  0xe3   : > { %761 = vmatprep.mubr.f32.mxu1 %v2138_v18  ;;  %1511 = vmatpush1.bf16.msra.mxu1 %v1476_v38 }
  0xe4   : > { %845 = vmatmul.mubr.f32.gmra.mrb[2].mxu0 %v538_v17  ;;  %1504 = vmatprep.subr.bf16.mxu1 %v1478_v41  ;;  %v681_v17 = vsub.s32 1, %v2249_v13 }
  0xe5   : > { %850 = vmatprep.mubr.f32.mxu0 %v543_v19  ;;  %1477 = vmatpush1.bf16.msra.mxu0 %v1476_v38  ;;  %v678_v19 = vrot.slane %v673_v16, %v677_v15 }
  0xe6   : > { %762 = vmatmul.mubr.f32.gmra.mrb[4].mxu1 %v531_v20  ;;  %1479 = vmatprep.subr.bf16.mxu0 %v1478_v41  ;;  %v682_v20 = vrot.slane %v673_v16, %v681_v17 }
  0xe7   : > { %767 = vmatprep.mubr.f32.mxu1 %v2145_v22  ;;  %1512 = vmatpush1.bf16.msra.mxu1 %v1480_v44 }
  0xe8   : > { %851 = vmatmul.mubr.f32.gmra.mrb[4].mxu0 %v539_v21  ;;  %1505 = vmatprep.subr.bf16.mxu1 %v1482_v47 }
  0xe9   : > { %856 = vmatprep.mubr.f32.mxu0 %v544_v23  ;;  %1481 = vmatpush1.bf16.msra.mxu0 %v1480_v44 }
  0xea   : > { %768 = vmatmul.mubr.f32.gmra.mrb[6].mxu1 %v532_v24  ;;  %1483 = vmatprep.subr.bf16.mxu0 %v1482_v47 }
  0xeb   : > { %1513 = vmatpush1.bf16.msra.mxu1 %v1484_v50  ;;  %1015 = vmatprep.mubr.f32.mxu1 %v1861_v11 }
  0xec   : > { %857 = vmatmul.mubr.f32.gmra.mrb[6].mxu0 %v540_v25  ;;  %1506 = vmatprep.subr.bf16.mxu1 %v1486_v53 }
  0xed   : > { %1485 = vmatpush1.bf16.msra.mxu0 %v1484_v50  ;;  %1003 = vmatprep.mubr.f32.mxu0 %v1861_v11 }
  0xee   : > { %1487 = vmatprep.subr.bf16.mxu0 %v1486_v53 }
  0xef   : > { %1514 = vmatpush1.bf16.msra.mxu1 %v1488_v56 }
  0xf0   : > { %1507 = vmatprep.subr.bf16.mxu1 %v1490_v59 }
  0xf1   : > { %1489 = vmatpush1.bf16.msra.mxu0 %v1488_v56 }
  0xf2   : > { %1491 = vmatprep.subr.bf16.mxu0 %v1490_v59 }
  0xf3   : > { %1515 = vmatpush1.bf16.msra.mxu1 %v1492_v62 }
  0xf4   : > { %1508 = vmatprep.subr.bf16.mxu1 %v1494_v1 }
  0xf5   : > { %1493 = vmatpush1.bf16.msra.mxu0 %v1492_v62 }
  0xf6   : > { %1495 = vmatprep.subr.bf16.mxu0 %v1494_v1 }
  0xf7   : > { %1516 = vmatpush1.bf16.msra.mxu1 %v1496_v4 }
  0xf8   : > { %1509 = vmatprep.subr.bf16.mxu1 %v1498_v7 }
  0xf9   : > { %1497 = vmatpush1.bf16.msra.mxu0 %v1496_v4 }
  0xfa   : > { %1499 = vmatprep.subr.bf16.mxu0 %v1498_v7 }
  0xfb   : > { %1517 = vmatpush1.bf16.msra.mxu1 %v1500_v10 }
  0xfd   : > { %1501 = vmatpush1.bf16.msra.mxu0 %v1500_v10 }
 0x1b1   : > { %v751_v21 = vpop.f32.mrb[0].mxu1 }
 0x1b2   : > { %v752_v23 = vadd.f32 %v751_v21, %v678_v19  ;;  %v753_v24 = vpop.f32.mrb[1].mxu1  ;;  %v927_v21 = vld [vmem:[%s2432_s15] sm:$0x3]  ;;  %s2436_s15 = smov %s2435_s10 }
 0x1b3   : > { %v840_v25 = vpop.f32.mrb[0].mxu0  ;;  %v754_v27 = vadd.f32 %v753_v24, %v682_v20  ;;  %v932_v24 = vrot.slane %v927_v21, %v677_v15 }
 0x1b4   : > { %v842_v28 = vpop.f32.mrb[1].mxu0  ;;  %v841_v29 = vadd.f32 %v840_v25, %v752_v23  ;;  %v1329_v23 = vld [vmem:[%s358_s20] ss:$0 sm:$0xff]  ;;  %v936_v25 = vrot.slane %v927_v21, %v681_v17  ;;  %s1333_s20 = sshll.u32 %s1841_s9, 3  ;;  %s1094_s9 = sshll.u32 %s2105_s17, 4  ;;  %s2292_s9 = int_to_ptr.vmem [resolvable:$true] %s1094_s9 }
 0x1b5   : > { %v843_v30 = vadd.f32 %v842_v28, %v754_v27  ;;  %v757_v31 = vpop.f32.mrb[2].mxu1  ;;  %s1073_s22 = sadd.s32 %s1333_s20, %s1332_s6  ;;  %s1717_s19 = scalar_lea.vmem %s2292_s9, 512 }
 0x1b6   : > { %v1325_v32 = vmul.f32 -1.442695, %v841_v29  ;;  %v758_v33 = vadd.f32 %v757_v31, %v678_v19  ;;  %v759_v34 = vpop.f32.mrb[3].mxu1  ;;  %v1036_v31 = vsub.f32 %v2131_v14, %v1329_v23  ;;  %s1334_s30 = sshll.u32 %s1073_s22, 7  ;;  %p1718_p1 = scmp.ne.s32.totalorder %s2292_s9, %s1717_s19 }
 0x1b7   : > { %v846_v35 = vpop.f32.mrb[2].mxu0  ;;  %v760_v36 = vadd.f32 %v759_v34, %v682_v20  ;;  %s2290_s26 = scalar_lea.hbm %s2434_s25, %s1334_s30  ;;  %s2299_s27 = scalar_lea.hbm %s2435_s10, %s1334_s30 }
 0x1b8   : > { %v848_v37 = vpop.f32.mrb[3].mxu0  ;;  %1635 = vpow2.f32 %v1325_v32  ;;  %v847_v38 = vadd.f32 %v846_v35, %v758_v33  ;;  %p1719_p2 = pnand %p1718_p1, %p2016_p11  ;;  %s1862_s6 = smov [#allocation10]  }
 0x1b9   : > { %v849_v39 = vadd.f32 %v848_v37, %v760_v36  ;;  %v763_v40 = vpop.f32.mrb[4].mxu1  ;;  %s1721_s20 = sshll.u32 %s1862_s6, 4  ;;  %s1722_s20 = int_to_ptr.vmem [resolvable:$false] %s1721_s20 }
 0x1ba   : > { %v1326_v41 = vmul.f32 -1.442695, %v847_v38  ;;  %v764_v42 = vadd.f32 %v763_v40, %v678_v19  ;;  %v765_v43 = vpop.f32.mrb[5].mxu1  ;;  %v1038_v40 = vsub.f32 %v2145_v22, %v1329_v23  ;;  %p1720_p4 = pneg %p1719_p2  ;;  %s1723_s22 = scalar_lea.vmem %s1722_s20, 1024 }
 0x1bb   : > { %v852_v44 = vpop.f32.mrb[4].mxu0  ;;  %v766_v45 = vadd.f32 %v765_v43, %v682_v20  ;;  %p1724_p5 = scmp.lt.s32.totalorder %s2292_s9, %s1722_s20  ;;  %p1725_p9 = scmp.lt.s32.totalorder %s1723_s22, %s1717_s19 }
 0x1bc   : > { %v854_v46 = vpop.f32.mrb[5].mxu0  ;;  %1637 = vpow2.f32 %v1326_v41  ;;  %v853_v47 = vadd.f32 %v852_v44, %v764_v42 }
 0x1bd   : > { %v855_v48 = vadd.f32 %v854_v46, %v766_v45  ;;  %v769_v49 = vpop.f32.mrb[6].mxu1  ;;  %p1726_p0 = por %p1725_p9, %p1724_p5 }
 0x1be   : > { %v1327_v50 = vmul.f32 -1.442695, %v853_v47  ;;  %v770_v51 = vadd.f32 %v769_v49, %v678_v19  ;;  %v771_v52 = vpop.f32.mrb[7].mxu1 }
 0x1bf   : > { %v858_v53 = vpop.f32.mrb[6].mxu0  ;;  %v772_v54 = vadd.f32 %v771_v52, %v682_v20  ;;  %p1727_p6 = pnand %p1726_p0, %p1720_p4 }
 0x1c0   : > { %v860_v55 = vpop.f32.mrb[7].mxu0  ;;  %1639 = vpow2.f32 %v1327_v50  ;;  %v859_v56 = vadd.f32 %v858_v53, %v770_v51 }
 0x1c1   : > { %v861_v57 = vadd.f32 %v860_v55, %v772_v54  ;;  %1641 = vtanh.f32 %v843_v30 }
 0x1c2   : > { %v1636_v58 = vpop.eup %1635  ;;  %v1328_v59 = vmul.f32 -1.442695, %v859_v56 }
 0x1c3   : > { %v875_v60 = vadd.f32 1.0, %v1636_v58 }
 0x1c4   : > { %1643 = vpow2.f32 %v1328_v59 }
 0x1c5   : > { %1645 = vrcp.f32 %v875_v60 }
 0x1c6   : > { %v1638_v61 = vpop.eup %1637  ;;  %1647 = vtanh.f32 %v849_v39 }
 0x1c7   : > { %v876_v62 = vadd.f32 1.0, %v1638_v61 }
 0x1c9   : > { %1649 = vrcp.f32 %v876_v62 }
 0x1ca   : > { %v1640_v63 = vpop.eup %1639  ;;  %1651 = vtanh.f32 %v855_v48 }
 0x1cb   : > { %v877_v0 = vadd.f32 1.0, %v1640_v63  ;;  %v1642_v1 = vpop.eup %1641 }
 0x1cd   : > { %1653 = vrcp.f32 %v877_v0 }
 0x1ce   : > { %v1644_v2 = vpop.eup %1643  ;;  %1655 = vtanh.f32 %v861_v57 }
 0x1cf   : > { %v1646_v3 = vpop.eup %1645  ;;  %v878_v4 = vadd.f32 1.0, %v1644_v2 }
 0x1d0   : > { %v891_v5 = vmul.f32 %v1646_v3, %v1642_v1  ;;  %v1648_v6 = vpop.eup %1647 }
 0x1d1   : > { %1657 = vrcp.f32 %v878_v4 }
 0x1d2   : > { %1004 = vmatmul.mubr.f32.vlgmr.msra.gmra.mrb[8].mxu0 %v891_v5 }
 0x1d3   : > { %v1650_v7 = vpop.eup %1649  ;;  %1009 = vmatprep.mubr.f32.mxu0 %v1861_v11 }
 0x1d4   : > { %v892_v8 = vmul.f32 %v1650_v7, %v1648_v6  ;;  %v1652_v9 = vpop.eup %1651 }
 0x1d6   : > { %1010 = vmatmul.mubr.f32.gmra.mrb[10].mxu0 %v892_v8 }
 0x1d7   : > { %v1654_v10 = vpop.eup %1653 }
 0x1d8   : > { %v893_v12 = vmul.f32 %v1654_v10, %v1652_v9  ;;  %v1656_v16 = vpop.eup %1655 }
 0x1da   : > { %1016 = vmatmul.mubr.f32.vlgmr.msra.gmra.mrb[8].mxu1 %v893_v12 }
 0x1db   : > { %v1658_v19 = vpop.eup %1657  ;;  %1021 = vmatprep.mubr.f32.mxu1 %v1861_v11  ;;  %v1035_v11 = vsub.f32 %v2124_v26, %v1329_v23  ;;  %v1037_v26 = vsub.f32 %v2138_v18, %v1329_v23 }
 0x1dc   : > { %v894_v20 = vmul.f32 %v1658_v19, %v1656_v16 }
 0x1de   : > { %1022 = vmatmul.mubr.f32.gmra.mrb[10].mxu1 %v894_v20 }
 0x2a5   : > { %v1005_v27 = vpop.f32.mrb[8].mxu0 }
 0x2a6   : > { %v1006_v28 = vadd.f32 %v1005_v27, %v932_v24  ;;  %v1007_v29 = vpop.f32.mrb[9].mxu0 }
 0x2a7   : > { %v1008_v30 = vadd.f32 %v1007_v29, %v936_v25 }
 0x2a8   : > { %v1039_v32 = vadd.f32 %v1035_v11, %v1006_v28 }
 0x2a9   : > { %1051 = vst [vmem:[%s2105_s17] sm:$0xff] %v1008_v30  ;;  %v1011_v33 = vpop.f32.mrb[10].mxu0 }
 0x2aa   : > { %v1043_v34 = vmul.f32 0.70710677, %v1039_v32  ;;  %v1012_v35 = vadd.f32 %v1011_v33, %v932_v24  ;;  %v1013_v15 = vpop.f32.mrb[11].mxu0 }
 0x2ab   : > { %v1014_v13 = vadd.f32 %v1013_v15, %v936_v25 }
 0x2ac   : > { %1047 = vst [vmem:[%s2103_s3] sm:$0xff] %v1043_v34  ;;  %v1040_v17 = vadd.f32 %v1036_v31, %v1012_v35 }
 0x2ad   : > { %1052 = vst [vmem:[%s2105_s17 + $0x8] sm:$0xff] %v1014_v13  ;;  %v1017_v36 = vpop.f32.mrb[8].mxu1 }
 0x2ae   : > { %v1044_v14 = vmul.f32 0.70710677, %v1040_v17  ;;  %v1018_v37 = vadd.f32 %v1017_v36, %v932_v24  ;;  %v1019_v38 = vpop.f32.mrb[9].mxu1 }
 0x2af   : > { %v1020_v39 = vadd.f32 %v1019_v38, %v936_v25 }
 0x2b0   : > { %1048 = vst [vmem:[%s2103_s3 + $0x8] sm:$0xff] %v1044_v14  ;;  %v1041_v41 = vadd.f32 %v1037_v26, %v1018_v37 }
 0x2b1   : > { %1053 = vst [vmem:[%s2105_s17 + $0x10] sm:$0xff] %v1020_v39  ;;  %v1023_v18 = vpop.f32.mrb[10].mxu1 }
 0x2b2   : > { %v1045_v42 = vmul.f32 0.70710677, %v1041_v41  ;;  %v1024_v43 = vadd.f32 %v1023_v18, %v932_v24  ;;  %v1025_v44 = vpop.f32.mrb[11].mxu1 }
 0x2b3   : > { %v1026_v45 = vadd.f32 %v1025_v44, %v936_v25 }
 0x2b4   : > { %1049 = vst [vmem:[%s2103_s3 + $0x10] sm:$0xff] %v1045_v42  ;;  %v1042_v22 = vadd.f32 %v1038_v40, %v1024_v43 }
 0x2b5   : > { %1054 = vst [vmem:[%s2105_s17 + $0x18] sm:$0xff] %v1026_v45 }
 0x2b6   : > { %v1046_v46 = vmul.f32 0.70710677, %v1042_v22 }
 0x2b7   : > { %1730 = shalt.err (!%p1727_p6)
}
 0x2b8   : > { %s1731_s17 = scalar_lea.hbm %s2290_s26, 512  ;;  %s1735_s13 = scalar_lea.hbm %s2434_s25, 2048 }
 0x2b9   : > { %p1732_p8 = scmp.ne.s32.totalorder %s2290_s26, %s1731_s17  ;;  %p1736_p13 = scmp.lt.u32.totalorder %s2290_s26, %s2434_s25 }
 0x2ba   : > { %p1737_p3 = scmp.lt.u32.totalorder %s1735_s13, %s1731_s17  ;;  %p1739_p1 = scmp.lt.u32.totalorder %s1731_s17, %s2290_s26 }
 0x2bb   : > { %p1733_p10 = pnand %p1732_p8, %p2016_p11 }
 0x2bc   : > { %p1738_p7 = por %p1737_p3, %p1736_p13 }
 0x2bd   : > { %p1734_p12 = pneg %p1733_p10 }
 0x2be   : > { %p1740_p2 = por %p1739_p1, %p1738_p7 }
 0x2c0   : > { %p1741_p4 = pnand %p1740_p2, %p1734_p12 }
 0x2c2   : > { %1744 = shalt.err (!%p1741_p4)
}
 0x2c3   : > { %s1863_s10 = smov 128   ;;  %s1864_s19 = smov 8   ;;  %1050 = vst [vmem:[%s2103_s3 + $0x18] sm:$0xff] %v1046_v46 }
 0x2c4   : > { %1541 = dma.vmem_to_hbm [thread:$0]  (%p2016_p11), %s2292_s9, 512, %s2290_s26, %s1061_s14, %s1863_s10, %s1863_s10, %s1864_s19  }
 0x2c5   : > { %s1056_s6 = scalar_lea.sflag [#allocation6], %s2081_s8  ;;  %s1745_s20 = scalar_lea.vmem %s2301_s21, 512 }
 0x2c6   : > { %p1746_p5 = scmp.ne.s32.totalorder %s2301_s21, %s1745_s20  ;;  %s1865_s22 = smov [#allocation9]  }
 0x2c7   : > { %s1749_s17 = sshll.u32 %s1865_s22, 4  ;;  %s1750_s17 = int_to_ptr.vmem [resolvable:$false] %s1749_s17 }
 0x2c8   : > { %p1747_p9 = pnand %p1746_p5, %p2016_p11  ;;  %s1751_s30 = scalar_lea.vmem %s1750_s17, 1024 }
 0x2c9   : > { %p1752_p6 = scmp.lt.s32.totalorder %s2301_s21, %s1750_s17  ;;  %p1753_p8 = scmp.lt.s32.totalorder %s1751_s30, %s1745_s20 }
 0x2ca   : > { %p1748_p0 = pneg %p1747_p9 }
 0x2cb   : > { %p1754_p10 = por %p1753_p8, %p1752_p6 }
 0x2cd   : > { %p1755_p12 = pnand %p1754_p10, %p1748_p0 }
 0x2cf   : > { %1758 = shalt.err (!%p1755_p12)
}
 0x2d0   : > { %s1759_s3 = scalar_lea.hbm %s2299_s27, 512  ;;  %s1763_s14 = scalar_lea.hbm %s2436_s15, 2048 }
 0x2d1   : > { %p1760_p13 = scmp.ne.s32.totalorder %s2299_s27, %s1759_s3  ;;  %p1764_p1 = scmp.lt.u32.totalorder %s2299_s27, %s2436_s15 }
 0x2d2   : > { %p1765_p2 = scmp.lt.u32.totalorder %s1763_s14, %s1759_s3  ;;  %p1767_p5 = scmp.lt.u32.totalorder %s1759_s3, %s2299_s27 }
 0x2d3   : > { %p1761_p3 = pnand %p1760_p13, %p2016_p11 }
 0x2d4   : > { %p1766_p4 = por %p1765_p2, %p1764_p1 }
 0x2d5   : > { %p1762_p7 = pneg %p1761_p3 }
 0x2d6   : > { %p1768_p9 = por %p1767_p5, %p1766_p4 }
 0x2d8   : > { %p1769_p0 = pnand %p1768_p9, %p1762_p7 }
 0x2da   : > { %1772 = shalt.err (!%p1769_p0)
}
 0x2db   : > { %1540 = dma.vmem_to_hbm [thread:$0]  (%p2016_p11), %s2301_s21, 512, %s2299_s27, %s1056_s6, %s1863_s10, %s1863_s10, %s1864_s19  }
 0x2dc PF: > { %s2437_s16 = sld [smem:[#allocation19_spill]]  ;;  %s2438_s18 = sld [smem:[#allocation21_spill]] }
 0x2dd   : > { %p1562_p6 = scmp.ge.s32.totalorder %s1853_s12, 2 }
 0x2e2   : > { %s1109_s20 = sand.u32 1, %s2437_s16   ;;  %p2439_p8 = scmp.ne.s32.totalorder %s2438_s18, 0 }
 0x2e3   : > { %s1110_s22 = scalar_lea.sflag [#allocation6], %s1109_s20 }
 0x2e4   : > { %p1553_p10 = pnand %p1562_p6, %p2439_p8 }
 0x2e6   : > { %1816 = dma.done.wait (!%p1553_p10), %s1110_s22, 512  }
 0x2e7   : > { %1818 = vsyncadd (!%p1553_p10), %s1110_s22, 4294966784  ;;  %s1119_s23 = scalar_lea.sflag [#allocation11], %s1109_s20 }
 0x2e8   : > { %1820 = dma.done.wait (!%p1553_p10), %s1119_s23, 512  }
 0x2e9   : > { %1822 = vsyncadd (!%p1553_p10), %s1119_s23, 4294966784  ;;  %s29_s12 = sadd.s32 1, %s1853_s12   ;;  %s2440_s30 = sld [smem:[#allocation20_spill]] }
 0x2ea   : > { %p26_p12 = scmp.ge.s32.totalorder %s29_s12, 6   ;;  %s2441_s10 = sld [smem:[#allocation22_spill]] }
 0x2eb   : > { %s2442_s8 = sld [smem:[#allocation24_spill]]  ;;  %s2443_s27 = smov %s1829_s28 }
 0x2ec   : > { %s2444_s28 = smov %s1833_s29  ;;  %s2445_s29 = smov %s2033_s7 }
 0x2ed   : > { %s2446_s9 = smov %s1849_s11  ;;  %28 = sbr.rel (!%p26_p12) target bundleno = 15 (0xf), region = 230 }
 0x2f1   : > { %s2447_s11 = smov %s2442_s8 }
 0x2f4   :  { %1124 = vsyncpa [#allocation5], 1 }
 0x2f5   :  { %1126 = vsyncpa [#allocation5 + $0x1], 1 }
 0x2f6   :  { %1127 = vsyncpa [#allocation8], 1 }
 0x2f7   :  { %1128 = vsyncpa [#allocation6], 1 }
 0x2f8   :  { %1130 = vsyncpa [#allocation6 + $0x1], 1 }
 0x2f9   :  { %1131 = vsyncpa [#allocation11], 1 }
 0x2fa   :  { %1133 = vsyncpa [#allocation11 + $0x1], 1 }
 0x2fb   :  { %1134 = vsyncmov [#allocation3] }
 0x2fe   :  { %s1135_s7 = vpop.sfrf %1134 }
 0x2ff   :  { %p1340_p11 = scmp.ne.s32.totalorder %s1135_s7, 0 }
 0x301   :  { %1139 = shalt.err (%p1340_p11)  }
 0x302   :  { %1141 = vsyncmov [#allocation3 + $0x1] }
 0x305   :  { %s1142_s21 = vpop.sfrf %1141 }
 0x306   :  { %p1341_p13 = scmp.ne.s32.totalorder %s1142_s21, 0 }
 0x308   :  { %1146 = shalt.err (%p1341_p13)  }

</bundles_post_ra>
